<compile_context>
chip_gen: v6e
topology: v6e:2x2x1
jax: 0.10.0
libtpu: 0.0.40
codegen_flags: <defaults>
</compile_context>

<pallas_src>
import jax
import jax.numpy as jnp
from jax.experimental import pallas as pl
from jax.experimental.pallas import tpu as pltpu

jax.config.update("jax_default_matmul_precision", "highest")

# ---- model hyper-parameters (small, deterministic synthetic config) ----
BATCH = 2
SEQ = 8            # query_len == key_len == val_len (required by the reference .view calls)
MODEL_DIM = 32
N_HEAD = 4
KEY_DIM = 8
VAL_DIM = 8        # must equal KEY_DIM (reference views the value proj of size n_head*key_dim)
TEMPERATURE = float(KEY_DIM) ** 0.5
EPS = 1e-6


def mha_kernel(q_in_ref, k_in_ref, v_in_ref, wqkv_ref, wfc_ref, ln_ref,
               out_ref, attn_ref):
    """Whole batch in one invocation; everything resident in VMEM."""
    B, L, D = q_in_ref.shape
    H = attn_ref.shape[1]
    dk = wqkv_ref.shape[2] // H
    dv = wfc_ref.shape[0] // H
    BL = B * L
    BH = B * H

    x_q = q_in_ref[...]                       # (B, L, D), residual source
    x_k = k_in_ref[...]
    x_v = v_in_ref[...]

    # ---- q/k/v projections: single 2-D MXU matmuls (B*L, D) @ (D, H*dk) ----
    q2 = jnp.dot(x_q.reshape(BL, D), wqkv_ref[0],
                 preferred_element_type=jnp.float32)             # (BL, H*dk)
    k2 = jnp.dot(x_k.reshape(BL, D), wqkv_ref[1],
                 preferred_element_type=jnp.float32)
    v2 = jnp.dot(x_v.reshape(BL, D), wqkv_ref[2],
                 preferred_element_type=jnp.float32)

    # fold 1/temperature into q (one small VPU pass instead of scaling scores)
    q2 = q2 * jnp.float32(1.0 / TEMPERATURE)

    def split_heads(x2, d):
        # (B*L, H*d) -> (B*H, L, d); static lane slices + leading-dim stack so
        # every step is a cheap, always-supported Mosaic op (no lane-splitting
        # shape_cast).
        per_head = [x2[:, h * d:(h + 1) * d].reshape(B, L, d) for h in range(H)]
        return jnp.stack(per_head, axis=1).reshape(BH, L, d)

    qh = split_heads(q2, dk)                  # (BH, Lq, dk)
    kh = split_heads(k2, dk)                  # (BH, Lk, dk)
    vh = split_heads(v2, dv)                  # (BH, Lv, dv)

    # scores = K @ Q^T / temperature (keys on the left, as in the reference)
    scores = jnp.einsum("nkd,nqd->nkq", kh, qh,
                        preferred_element_type=jnp.float32)      # (BH, Lk, Lq)

    # TODO(synk): mask==0 -> min_val fill not implemented (mask=None path only).

    # numerically stable softmax over the last (query) axis — exact divide
    m = jnp.max(scores, axis=-1, keepdims=True)
    e = jnp.exp(scores - m)
    p = e / jnp.sum(e, axis=-1, keepdims=True)

    attn_ref[...] = p.reshape(B, H, L, L)     # leading-dim split only (free)

    # output = attn @ V -> (BH, Lk, dv)
    o = jnp.einsum("nkq,nqd->nkd", p, vh, preferred_element_type=jnp.float32)

    # concat heads back: (BH, L, dv) -> (B, L, H*dv) via lane-axis concat (XLU)
    o4 = o.reshape(B, H, L, dv)
    o_cat = jnp.concatenate([o4[:, h] for h in range(H)], axis=-1)   # (B, L, H*dv)
    o_cat = o_cat.reshape(BL, H * dv)

    # fc projection: one (B*L, H*dv) @ (H*dv, D) matmul (reference concat @ Wfc)
    proj = jnp.dot(o_cat, wfc_ref[...], preferred_element_type=jnp.float32)

    # residual add + LayerNorm (biased variance, eps=1e-6) + affine
    y = proj.reshape(B, L, D) + x_q
    mean = jnp.mean(y, axis=-1, keepdims=True)
    var = jnp.mean((y - mean) * (y - mean), axis=-1, keepdims=True)
    y = (y - mean) * jax.lax.rsqrt(var + EPS)
    y = y * ln_ref[0] + ln_ref[1]             # gamma / beta, each (1, D)

    out_ref[...] = y


def pack_params(wq_t, wk_t, wv_t, gamma, beta):
    """Host-side parameter packing (done once, outside the jitted call)."""
    wqkv = jnp.stack([wq_t, wk_t, wv_t], axis=0)                          # (3, D, H*dk)
    ln = jnp.concatenate([gamma, beta], axis=0).reshape(2, 1, gamma.shape[-1])
    return wqkv, ln


@jax.jit
def multi_head_attention(queries, keys, values, wqkv, wfc_t, ln):
    B, L, D = queries.shape
    vmem = pl.BlockSpec(memory_space=pltpu.MemorySpace.VMEM)
    out, attn = pl.pallas_call(
        mha_kernel,
        out_shape=(
            jax.ShapeDtypeStruct((B, L, D), jnp.float32),
            jax.ShapeDtypeStruct((B, N_HEAD, L, L), jnp.float32),
        ),
        in_specs=[vmem] * 6,
        out_specs=(vmem, vmem),
        cost_estimate=pl.CostEstimate(
            flops=160_000, transcendentals=600, bytes_accessed=27_000),
    )(queries, keys, values, wqkv, wfc_t, ln)
    return out, attn


def reference(queries, keys, values, wq_t, wk_t, wv_t, wfc_t, gamma, beta):
    """Pure-JAX mirror of the PyTorch forward pass (for correctness check)."""
    B, L, D = queries.shape
    q = (queries @ wq_t).reshape(B, L, N_HEAD, KEY_DIM).transpose(0, 2, 1, 3)
    k = (keys @ wk_t).reshape(B, L, N_HEAD, KEY_DIM).transpose(0, 2, 1, 3)
    v = (values @ wv_t).reshape(B, L, N_HEAD, VAL_DIM).transpose(0, 2, 1, 3)
    scores = jnp.einsum("bhkd,bhqd->bhkq", k, q) / TEMPERATURE
    attn = jax.nn.softmax(scores, axis=-1)
    out = jnp.einsum("bhkq,bhqd->bhkd", attn, v)
    out = out.transpose(0, 2, 1, 3).reshape(B, L, N_HEAD * VAL_DIM)
    out = out @ wfc_t + queries
    mean = jnp.mean(out, axis=-1, keepdims=True)
    var = jnp.mean((out - mean) ** 2, axis=-1, keepdims=True)
    out = (out - mean) / jnp.sqrt(var + EPS) * gamma[0] + beta[0]
    return out, attn


if __name__ == "__main__":
    key = jax.random.PRNGKey(0)
    k_q, k_k, k_v, k_wq, k_wk, k_wv, k_fc, k_g, k_b = jax.random.split(key, 9)

    queries = jax.random.normal(k_q, (BATCH, SEQ, MODEL_DIM), dtype=jnp.float32)
    keys = jax.random.normal(k_k, (BATCH, SEQ, MODEL_DIM), dtype=jnp.float32)
    values = jax.random.normal(k_v, (BATCH, SEQ, MODEL_DIM), dtype=jnp.float32)

    HD = N_HEAD * KEY_DIM
    scale = 1.0 / (MODEL_DIM ** 0.5)
    # PyTorch Linear weights are (out, in); we pass them transposed: (in, out).
    wq_t = (jax.random.normal(k_wq, (HD, MODEL_DIM), dtype=jnp.float32) * scale).T
    wk_t = (jax.random.normal(k_wk, (HD, MODEL_DIM), dtype=jnp.float32) * scale).T
    wv_t = (jax.random.normal(k_wv, (HD, MODEL_DIM), dtype=jnp.float32) * scale).T
    wfc_t = (jax.random.normal(k_fc, (MODEL_DIM, HD), dtype=jnp.float32) * (1.0 / HD ** 0.5)).T
    gamma = 1.0 + 0.01 * jax.random.normal(k_g, (1, MODEL_DIM), dtype=jnp.float32)
    beta = 0.01 * jax.random.normal(k_b, (1, MODEL_DIM), dtype=jnp.float32)

    wqkv, ln = pack_params(wq_t, wk_t, wv_t, gamma, beta)

    out, attn = multi_head_attention(queries, keys, values, wqkv, wfc_t, ln)
    out = jax.block_until_ready(out)
    attn = jax.block_until_ready(attn)

    ref_out, ref_attn = reference(queries, keys, values, wq_t, wk_t, wv_t, wfc_t, gamma, beta)
    assert out.shape == (BATCH, SEQ, MODEL_DIM)
    assert attn.shape == (BATCH, N_HEAD, SEQ, SEQ)
    assert jnp.allclose(out, ref_out, atol=1e-4, rtol=1e-4), "output mismatch"
    assert jnp.allclose(attn, ref_attn, atol=1e-4, rtol=1e-4), "attention mismatch"

    print("KERNEL_OK")
</pallas_src>

<mosaic_0001>
module attributes {stable_mosaic.version = 11 : i64} {
  func.func @mha_kernel(%arg0: memref<2x8x32xf32, #tpu.memory_space<vmem>>, %arg1: memref<2x8x32xf32, #tpu.memory_space<vmem>>, %arg2: memref<2x8x32xf32, #tpu.memory_space<vmem>>, %arg3: memref<3x32x32xf32, #tpu.memory_space<vmem>>, %arg4: memref<32x32xf32, #tpu.memory_space<vmem>>, %arg5: memref<2x1x32xf32, #tpu.memory_space<vmem>>, %arg6: memref<2x8x32xf32, #tpu.memory_space<vmem>>, %arg7: memref<2x4x8x8xf32, #tpu.memory_space<vmem>>) attributes {dimension_semantics = [], scalar_prefetch = 0 : i64, scratch_operands = 0 : i64, tpu.core_type = #tpu.core_type<tc>} {
    %c0 = arith.constant 0 : index
    %c0_0 = arith.constant 0 : index
    %c0_1 = arith.constant 0 : index
    %0 = vector.load %arg0[%c0, %c0_0, %c0_1] : memref<2x8x32xf32, #tpu.memory_space<vmem>>, vector<2x8x32xf32>
    %c0_2 = arith.constant 0 : index
    %c0_3 = arith.constant 0 : index
    %c0_4 = arith.constant 0 : index
    %1 = vector.load %arg1[%c0_2, %c0_3, %c0_4] : memref<2x8x32xf32, #tpu.memory_space<vmem>>, vector<2x8x32xf32>
    %c0_5 = arith.constant 0 : index
    %c0_6 = arith.constant 0 : index
    %c0_7 = arith.constant 0 : index
    %2 = vector.load %arg2[%c0_5, %c0_6, %c0_7] : memref<2x8x32xf32, #tpu.memory_space<vmem>>, vector<2x8x32xf32>
    %3 = vector.shape_cast %0 : vector<2x8x32xf32> to vector<16x32xf32>
    %c0_8 = arith.constant 0 : index
    %c0_9 = arith.constant 0 : index
    %c0_10 = arith.constant 0 : index
    %4 = vector.load %arg3[%c0_8, %c0_9, %c0_10] : memref<3x32x32xf32, #tpu.memory_space<vmem>>, vector<1x32x32xf32>
    %5 = vector.shape_cast %4 : vector<1x32x32xf32> to vector<32x32xf32>
    %cst = arith.constant dense<0.000000e+00> : vector<16x32xf32>
    %6 = tpu.matmul %3, %5, %cst {dimension_numbers = #tpu.dot_dimension_numbers<[1], [0], [0], [1], [0, 0, 1, 1], [], []>, precision = #tpu.contract_precision<fp32>} : vector<16x32xf32>, vector<32x32xf32>, vector<16x32xf32> -> vector<16x32xf32>
    %7 = vector.shape_cast %1 : vector<2x8x32xf32> to vector<16x32xf32>
    %c1 = arith.constant 1 : index
    %c0_11 = arith.constant 0 : index
    %c0_12 = arith.constant 0 : index
    %8 = vector.load %arg3[%c1, %c0_11, %c0_12] : memref<3x32x32xf32, #tpu.memory_space<vmem>>, vector<1x32x32xf32>
    %9 = vector.shape_cast %8 : vector<1x32x32xf32> to vector<32x32xf32>
    %cst_13 = arith.constant dense<0.000000e+00> : vector<16x32xf32>
    %10 = tpu.matmul %7, %9, %cst_13 {dimension_numbers = #tpu.dot_dimension_numbers<[1], [0], [0], [1], [0, 0, 1, 1], [], []>, precision = #tpu.contract_precision<fp32>} : vector<16x32xf32>, vector<32x32xf32>, vector<16x32xf32> -> vector<16x32xf32>
    %11 = vector.shape_cast %2 : vector<2x8x32xf32> to vector<16x32xf32>
    %c2 = arith.constant 2 : index
    %c0_14 = arith.constant 0 : index
    %c0_15 = arith.constant 0 : index
    %12 = vector.load %arg3[%c2, %c0_14, %c0_15] : memref<3x32x32xf32, #tpu.memory_space<vmem>>, vector<1x32x32xf32>
    %13 = vector.shape_cast %12 : vector<1x32x32xf32> to vector<32x32xf32>
    %cst_16 = arith.constant dense<0.000000e+00> : vector<16x32xf32>
    %14 = tpu.matmul %11, %13, %cst_16 {dimension_numbers = #tpu.dot_dimension_numbers<[1], [0], [0], [1], [0, 0, 1, 1], [], []>, precision = #tpu.contract_precision<fp32>} : vector<16x32xf32>, vector<32x32xf32>, vector<16x32xf32> -> vector<16x32xf32>
    %cst_17 = arith.constant 0.353553385 : f32
    %15 = vector.broadcast %cst_17 : f32 to vector<16x32xf32>
    %16 = arith.mulf %6, %15 : vector<16x32xf32>
    %17 = vector.extract_strided_slice %16 {offsets = [0, 0], sizes = [16, 8], strides = [1, 1]} : vector<16x32xf32> to vector<16x8xf32>
    %18 = vector.shape_cast %17 : vector<16x8xf32> to vector<2x8x8xf32>
    %19 = vector.extract_strided_slice %16 {offsets = [0, 8], sizes = [16, 8], strides = [1, 1]} : vector<16x32xf32> to vector<16x8xf32>
    %20 = vector.shape_cast %19 : vector<16x8xf32> to vector<2x8x8xf32>
    %21 = vector.extract_strided_slice %16 {offsets = [0, 16], sizes = [16, 8], strides = [1, 1]} : vector<16x32xf32> to vector<16x8xf32>
    %22 = vector.shape_cast %21 : vector<16x8xf32> to vector<2x8x8xf32>
    %23 = vector.extract_strided_slice %16 {offsets = [0, 24], sizes = [16, 8], strides = [1, 1]} : vector<16x32xf32> to vector<16x8xf32>
    %24 = vector.shape_cast %23 : vector<16x8xf32> to vector<2x8x8xf32>
    %25 = vector.shape_cast %18 : vector<2x8x8xf32> to vector<2x1x8x8xf32>
    %26 = vector.shape_cast %20 : vector<2x8x8xf32> to vector<2x1x8x8xf32>
    %27 = vector.shape_cast %22 : vector<2x8x8xf32> to vector<2x1x8x8xf32>
    %28 = vector.shape_cast %24 : vector<2x8x8xf32> to vector<2x1x8x8xf32>
    %29 = tpu.concatenate %25, %26, %27, %28 in 1 : vector<2x1x8x8xf32>, vector<2x1x8x8xf32>, vector<2x1x8x8xf32>, vector<2x1x8x8xf32> -> vector<2x4x8x8xf32>
    %30 = vector.shape_cast %29 : vector<2x4x8x8xf32> to vector<8x8x8xf32>
    %31 = vector.extract_strided_slice %10 {offsets = [0, 0], sizes = [16, 8], strides = [1, 1]} : vector<16x32xf32> to vector<16x8xf32>
    %32 = vector.shape_cast %31 : vector<16x8xf32> to vector<2x8x8xf32>
    %33 = vector.extract_strided_slice %10 {offsets = [0, 8], sizes = [16, 8], strides = [1, 1]} : vector<16x32xf32> to vector<16x8xf32>
    %34 = vector.shape_cast %33 : vector<16x8xf32> to vector<2x8x8xf32>
    %35 = vector.extract_strided_slice %10 {offsets = [0, 16], sizes = [16, 8], strides = [1, 1]} : vector<16x32xf32> to vector<16x8xf32>
    %36 = vector.shape_cast %35 : vector<16x8xf32> to vector<2x8x8xf32>
    %37 = vector.extract_strided_slice %10 {offsets = [0, 24], sizes = [16, 8], strides = [1, 1]} : vector<16x32xf32> to vector<16x8xf32>
    %38 = vector.shape_cast %37 : vector<16x8xf32> to vector<2x8x8xf32>
    %39 = vector.shape_cast %32 : vector<2x8x8xf32> to vector<2x1x8x8xf32>
    %40 = vector.shape_cast %34 : vector<2x8x8xf32> to vector<2x1x8x8xf32>
    %41 = vector.shape_cast %36 : vector<2x8x8xf32> to vector<2x1x8x8xf32>
    %42 = vector.shape_cast %38 : vector<2x8x8xf32> to vector<2x1x8x8xf32>
    %43 = tpu.concatenate %39, %40, %41, %42 in 1 : vector<2x1x8x8xf32>, vector<2x1x8x8xf32>, vector<2x1x8x8xf32>, vector<2x1x8x8xf32> -> vector<2x4x8x8xf32>
    %44 = vector.shape_cast %43 : vector<2x4x8x8xf32> to vector<8x8x8xf32>
    %45 = vector.extract_strided_slice %14 {offsets = [0, 0], sizes = [16, 8], strides = [1, 1]} : vector<16x32xf32> to vector<16x8xf32>
    %46 = vector.shape_cast %45 : vector<16x8xf32> to vector<2x8x8xf32>
    %47 = vector.extract_strided_slice %14 {offsets = [0, 8], sizes = [16, 8], strides = [1, 1]} : vector<16x32xf32> to vector<16x8xf32>
    %48 = vector.shape_cast %47 : vector<16x8xf32> to vector<2x8x8xf32>
    %49 = vector.extract_strided_slice %14 {offsets = [0, 16], sizes = [16, 8], strides = [1, 1]} : vector<16x32xf32> to vector<16x8xf32>
    %50 = vector.shape_cast %49 : vector<16x8xf32> to vector<2x8x8xf32>
    %51 = vector.extract_strided_slice %14 {offsets = [0, 24], sizes = [16, 8], strides = [1, 1]} : vector<16x32xf32> to vector<16x8xf32>
    %52 = vector.shape_cast %51 : vector<16x8xf32> to vector<2x8x8xf32>
    %53 = vector.shape_cast %46 : vector<2x8x8xf32> to vector<2x1x8x8xf32>
    %54 = vector.shape_cast %48 : vector<2x8x8xf32> to vector<2x1x8x8xf32>
    %55 = vector.shape_cast %50 : vector<2x8x8xf32> to vector<2x1x8x8xf32>
    %56 = vector.shape_cast %52 : vector<2x8x8xf32> to vector<2x1x8x8xf32>
    %57 = tpu.concatenate %53, %54, %55, %56 in 1 : vector<2x1x8x8xf32>, vector<2x1x8x8xf32>, vector<2x1x8x8xf32>, vector<2x1x8x8xf32> -> vector<2x4x8x8xf32>
    %58 = vector.shape_cast %57 : vector<2x4x8x8xf32> to vector<8x8x8xf32>
    "tpu.trace_start"() <{level = 10 : i32, message = "nkd,nqd->nkq"}> : () -> ()
    %cst_18 = arith.constant dense<0.000000e+00> : vector<8x8x8xf32>
    %59 = tpu.matmul %44, %30, %cst_18 {dimension_numbers = #tpu.dot_dimension_numbers<[2], [2], [1], [1], [0, 0, 0, 1, 1, 1], [0], [0]>, precision = #tpu.contract_precision<fp32>} : vector<8x8x8xf32>, vector<8x8x8xf32>, vector<8x8x8xf32> -> vector<8x8x8xf32>
    "tpu.trace_stop"() : () -> ()
    %cst_19 = arith.constant dense<0xFF800000> : vector<8x8xf32>
    %60 = vector.multi_reduction <maximumf>, %59, %cst_19 [2] : vector<8x8x8xf32> to vector<8x8xf32>
    %61 = vector.shape_cast %60 : vector<8x8xf32> to vector<8x8x1xf32>
    %62 = vector.broadcast %61 : vector<8x8x1xf32> to vector<8x8x8xf32>
    %63 = arith.subf %59, %62 : vector<8x8x8xf32>
    %64 = math.exp %63 : vector<8x8x8xf32>
    %cst_20 = arith.constant dense<0.000000e+00> : vector<8x8xf32>
    %65 = vector.multi_reduction <add>, %64, %cst_20 [2] : vector<8x8x8xf32> to vector<8x8xf32>
    %66 = vector.shape_cast %65 : vector<8x8xf32> to vector<8x8x1xf32>
    %67 = vector.broadcast %66 : vector<8x8x1xf32> to vector<8x8x8xf32>
    %68 = arith.divf %64, %67 : vector<8x8x8xf32>
    %69 = vector.shape_cast %68 : vector<8x8x8xf32> to vector<2x4x8x8xf32>
    %c0_21 = arith.constant 0 : index
    %c0_22 = arith.constant 0 : index
    %c0_23 = arith.constant 0 : index
    %c0_24 = arith.constant 0 : index
    %70 = vector.load %arg7[%c0_21, %c0_22, %c0_23, %c0_24] : memref<2x4x8x8xf32, #tpu.memory_space<vmem>>, vector<2x4x8x8xf32>
    tpu.vector_store %arg7[%c0_21, %c0_22, %c0_23, %c0_24], %69 {strides = array<i32>} : memref<2x4x8x8xf32, #tpu.memory_space<vmem>>, vector<2x4x8x8xf32>,
    "tpu.trace_start"() <{level = 10 : i32, message = "nkq,nqd->nkd"}> : () -> ()
    %cst_25 = arith.constant dense<0.000000e+00> : vector<8x8x8xf32>
    %71 = tpu.matmul %68, %58, %cst_25 {dimension_numbers = #tpu.dot_dimension_numbers<[2], [1], [1], [2], [0, 0, 0, 1, 1, 2], [0], [0]>, precision = #tpu.contract_precision<fp32>} : vector<8x8x8xf32>, vector<8x8x8xf32>, vector<8x8x8xf32> -> vector<8x8x8xf32>
    "tpu.trace_stop"() : () -> ()
    %72 = vector.shape_cast %71 : vector<8x8x8xf32> to vector<2x4x8x8xf32>
    %73 = vector.extract_strided_slice %72 {offsets = [0, 0, 0, 0], sizes = [2, 1, 8, 8], strides = [1, 1, 1, 1]} : vector<2x4x8x8xf32> to vector<2x1x8x8xf32>
    %74 = vector.shape_cast %73 : vector<2x1x8x8xf32> to vector<2x8x8xf32>
    %75 = vector.extract_strided_slice %72 {offsets = [0, 1, 0, 0], sizes = [2, 1, 8, 8], strides = [1, 1, 1, 1]} : vector<2x4x8x8xf32> to vector<2x1x8x8xf32>
    %76 = vector.shape_cast %75 : vector<2x1x8x8xf32> to vector<2x8x8xf32>
    %77 = vector.extract_strided_slice %72 {offsets = [0, 2, 0, 0], sizes = [2, 1, 8, 8], strides = [1, 1, 1, 1]} : vector<2x4x8x8xf32> to vector<2x1x8x8xf32>
    %78 = vector.shape_cast %77 : vector<2x1x8x8xf32> to vector<2x8x8xf32>
    %79 = vector.extract_strided_slice %72 {offsets = [0, 3, 0, 0], sizes = [2, 1, 8, 8], strides = [1, 1, 1, 1]} : vector<2x4x8x8xf32> to vector<2x1x8x8xf32>
    %80 = vector.shape_cast %79 : vector<2x1x8x8xf32> to vector<2x8x8xf32>
    %81 = tpu.concatenate %74, %76, %78, %80 in 2 : vector<2x8x8xf32>, vector<2x8x8xf32>, vector<2x8x8xf32>, vector<2x8x8xf32> -> vector<2x8x32xf32>
    %82 = vector.shape_cast %81 : vector<2x8x32xf32> to vector<16x32xf32>
    %c0_26 = arith.constant 0 : index
    %c0_27 = arith.constant 0 : index
    %83 = vector.load %arg4[%c0_26, %c0_27] : memref<32x32xf32, #tpu.memory_space<vmem>>, vector<32x32xf32>
    %cst_28 = arith.constant dense<0.000000e+00> : vector<16x32xf32>
    %84 = tpu.matmul %82, %83, %cst_28 {dimension_numbers = #tpu.dot_dimension_numbers<[1], [0], [0], [1], [0, 0, 1, 1], [], []>, precision = #tpu.contract_precision<fp32>} : vector<16x32xf32>, vector<32x32xf32>, vector<16x32xf32> -> vector<16x32xf32>
    %85 = vector.shape_cast %84 : vector<16x32xf32> to vector<2x8x32xf32>
    %86 = arith.addf %85, %0 : vector<2x8x32xf32>
    %cst_29 = arith.constant dense<0.000000e+00> : vector<2x8xf32>
    %87 = vector.multi_reduction <add>, %86, %cst_29 [2] : vector<2x8x32xf32> to vector<2x8xf32>
    %88 = vector.shape_cast %87 : vector<2x8xf32> to vector<2x8x1xf32>
    %cst_30 = arith.constant 3.200000e+01 : f32
    %89 = vector.broadcast %cst_30 : f32 to vector<2x8x1xf32>
    %90 = arith.divf %88, %89 : vector<2x8x1xf32>
    %91 = vector.broadcast %90 : vector<2x8x1xf32> to vector<2x8x32xf32>
    %92 = arith.subf %86, %91 : vector<2x8x32xf32>
    %93 = vector.broadcast %90 : vector<2x8x1xf32> to vector<2x8x32xf32>
    %94 = arith.subf %86, %93 : vector<2x8x32xf32>
    %95 = arith.mulf %92, %94 : vector<2x8x32xf32>
    %cst_31 = arith.constant dense<0.000000e+00> : vector<2x8xf32>
    %96 = vector.multi_reduction <add>, %95, %cst_31 [2] : vector<2x8x32xf32> to vector<2x8xf32>
    %97 = vector.shape_cast %96 : vector<2x8xf32> to vector<2x8x1xf32>
    %cst_32 = arith.constant 3.200000e+01 : f32
    %98 = vector.broadcast %cst_32 : f32 to vector<2x8x1xf32>
    %99 = arith.divf %97, %98 : vector<2x8x1xf32>
    %100 = vector.broadcast %90 : vector<2x8x1xf32> to vector<2x8x32xf32>
    %101 = arith.subf %86, %100 : vector<2x8x32xf32>
    %cst_33 = arith.constant 9.99999997E-7 : f32
    %102 = vector.broadcast %cst_33 : f32 to vector<2x8x1xf32>
    %103 = arith.addf %99, %102 : vector<2x8x1xf32>
    %104 = math.rsqrt %103 : vector<2x8x1xf32>
    %105 = vector.broadcast %104 : vector<2x8x1xf32> to vector<2x8x32xf32>
    %106 = arith.mulf %101, %105 : vector<2x8x32xf32>
    %c0_34 = arith.constant 0 : index
    %c0_35 = arith.constant 0 : index
    %c0_36 = arith.constant 0 : index
    %107 = vector.load %arg5[%c0_34, %c0_35, %c0_36] : memref<2x1x32xf32, #tpu.memory_space<vmem>>, vector<1x1x32xf32>
    %108 = vector.shape_cast %107 : vector<1x1x32xf32> to vector<1x32xf32>
    %109 = vector.shape_cast %108 : vector<1x32xf32> to vector<1x1x32xf32>
    %110 = vector.broadcast %109 : vector<1x1x32xf32> to vector<2x8x32xf32>
    %111 = arith.mulf %106, %110 : vector<2x8x32xf32>
    %c1_37 = arith.constant 1 : index
    %c0_38 = arith.constant 0 : index
    %c0_39 = arith.constant 0 : index
    %112 = vector.load %arg5[%c1_37, %c0_38, %c0_39] : memref<2x1x32xf32, #tpu.memory_space<vmem>>, vector<1x1x32xf32>
    %113 = vector.shape_cast %112 : vector<1x1x32xf32> to vector<1x32xf32>
    %114 = vector.shape_cast %113 : vector<1x32xf32> to vector<1x1x32xf32>
    %115 = vector.broadcast %114 : vector<1x1x32xf32> to vector<2x8x32xf32>
    %116 = arith.addf %111, %115 : vector<2x8x32xf32>
    %c0_40 = arith.constant 0 : index
    %c0_41 = arith.constant 0 : index
    %c0_42 = arith.constant 0 : index
    %117 = vector.load %arg6[%c0_40, %c0_41, %c0_42] : memref<2x8x32xf32, #tpu.memory_space<vmem>>, vector<2x8x32xf32>
    tpu.vector_store %arg6[%c0_40, %c0_41, %c0_42], %116 {strides = array<i32>} : memref<2x8x32xf32, #tpu.memory_space<vmem>>, vector<2x8x32xf32>,
    return
  }
}

</mosaic_0001>

<bundles_post_ra>
// kernel: multi_head_attention.1
= control target key start
LH: loop header
LB: loop body
LE: loop exit
PB: predicated region body
PF: predicated region fallthrough
CT: control target
= control target key end

     0   :  { %13 = vsyncpa [#allocation3], 0  ;;  %s12083_s0 = inlined_call_operand.hbm [shape: f32[2,8,32], index: 0, kind: input, shape index: {}]   ;;  %s12084_s1 = inlined_call_operand.hbm [shape: f32[2,8,32], index: 1, kind: input, shape index: {}]   ;;  %s12085_s2 = inlined_call_operand.hbm [shape: f32[2,8,32], index: 2, kind: input, shape index: {}]   ;;  %s12086_s3 = inlined_call_operand.hbm [shape: f32[3,32,32], index: 3, kind: input, shape index: {}]   ;;  %s12087_s4 = inlined_call_operand.hbm [shape: f32[32,32], index: 4, kind: input, shape index: {}]   ;;  %s12088_s5 = inlined_call_operand.vmem [shape: f32[2,1,32], index: 5, kind: input, shape index: {}]   ;;  %s12089_s6 = inlined_call_operand.hbm [shape: f32[2,8,32], index: 6, kind: output, shape index: {0}]   ;;  %s12090_s7 = inlined_call_operand.hbm [shape: f32[2,4,8,8], index: 7, kind: output, shape index: {1}]  }
   0x1   :  { %14 = vsyncpa [#allocation6], 0 }
   0x2   :  { %15 = vsyncpa [#allocation9], 0 }
   0x3   :  { %16 = vsyncpa [#allocation4], 0 }
   0x4   :  { %17 = vsyncpa [#allocation13], 0  ;;  %s10999_s24 = smov [#allocation5]   ;;  %s11000_s26 = smov [#allocation8]  }
   0x5   :  { %s35_s25 = sshll.u32 %s10999_s24, 4  ;;  %s59_s27 = sshll.u32 %s11000_s26, 4  ;;  %s36_s25 = int_to_ptr.vmem [resolvable:$true] %s35_s25  ;;  %s60_s27 = int_to_ptr.vmem [resolvable:$true] %s59_s27 }
   0x6   :  { %s10857_s28 = scalar_lea.vmem %s36_s25, 256  ;;  %p10862_p1 = scmp.lt.s32.totalorder %s36_s25, %s36_s25 }
   0x7   :  { %p10858_p0 = scmp.ne.s32.totalorder %s36_s25, %s10857_s28  ;;  %p10863_p2 = scmp.lt.s32.totalorder %s10857_s28, %s10857_s28 }
   0x9   :  { %p10864_p3 = por %p10863_p2, %p10862_p1 }
   0xb   :  { %p10865_p4 = pnand %p10864_p3, %p10858_p0 }
   0xd   :  { %10868 = shalt.err (!%p10865_p4)
}
   0xe   :  { %s11001_s29 = smov 128   ;;  %s11002_s30 = smov 8  }
   0xf   :  { %41 = dma.hbm_to_vmem [thread:$0]  %s12084_s1, 256, %s36_s25, [#allocation6], %s11001_s29, %s11001_s29, %s11002_s30  }
  0x10   :  { %s10877_s10 = scalar_lea.vmem %s60_s27, 1536  ;;  %p10882_p6 = scmp.lt.s32.totalorder %s60_s27, %s60_s27 }
  0x11   :  { %p10878_p5 = scmp.ne.s32.totalorder %s60_s27, %s10877_s10  ;;  %p10883_p7 = scmp.lt.s32.totalorder %s10877_s10, %s10877_s10 }
  0x13   :  { %p10884_p8 = por %p10883_p7, %p10882_p6 }
  0x15   :  { %p10885_p9 = pnand %p10884_p8, %p10878_p5 }
  0x17   :  { %10888 = shalt.err (!%p10885_p9)
}
  0x18   :  { %65 = dma.hbm_to_vmem [thread:$0]  %s12086_s3, 1536, %s60_s27, [#allocation9], %s11001_s29, %s11001_s29, %s11002_s30  }
  0x19   :  { %s11003_s13 = smov [#allocation2]   ;;  %s11004_s15 = smov [#allocation7]  }
  0x1a   :  { %s23_s14 = sshll.u32 %s11003_s13, 4  ;;  %s47_s16 = sshll.u32 %s11004_s15, 4  ;;  %s24_s14 = int_to_ptr.vmem [resolvable:$true] %s23_s14  ;;  %s48_s16 = int_to_ptr.vmem [resolvable:$true] %s47_s16 }
  0x1b   :  { %s10897_s1 = scalar_lea.vmem %s24_s14, 256  ;;  %p10902_p11 = scmp.lt.s32.totalorder %s24_s14, %s24_s14 }
  0x1c   :  { %p10898_p10 = scmp.ne.s32.totalorder %s24_s14, %s10897_s1  ;;  %p10903_p12 = scmp.lt.s32.totalorder %s10897_s1, %s10897_s1 }
  0x1e   :  { %p10904_p13 = por %p10903_p12, %p10902_p11 }
  0x20   :  { %p10905_p0 = pnand %p10904_p13, %p10898_p10 }
  0x22   :  { %10908 = shalt.err (!%p10905_p0)
}
  0x23   :  { %29 = dma.hbm_to_vmem [thread:$0]  %s12083_s0, 256, %s24_s14, [#allocation3], %s11001_s29, %s11001_s29, %s11002_s30  }
  0x24   :  { %s10917_s3 = scalar_lea.vmem %s48_s16, 256  ;;  %p10922_p2 = scmp.lt.s32.totalorder %s48_s16, %s48_s16 }
  0x25   :  { %p10918_p1 = scmp.ne.s32.totalorder %s48_s16, %s10917_s3  ;;  %p10923_p3 = scmp.lt.s32.totalorder %s10917_s3, %s10917_s3 }
  0x27   :  { %p10924_p4 = por %p10923_p3, %p10922_p2 }
  0x29   :  { %p10925_p5 = pnand %p10924_p4, %p10918_p1 }
  0x2b   :  { %10928 = shalt.err (!%p10925_p5)
}
  0x2c   :  { %53 = dma.hbm_to_vmem [thread:$0]  %s12085_s2, 256, %s48_s16, [#allocation6], %s11001_s29, %s11001_s29, %s11002_s30  }
  0x2d   :  { %s11005_s21 = smov [#allocation10]  }
  0x2e   :  { %s71_s22 = sshll.u32 %s11005_s21, 4  ;;  %s72_s22 = int_to_ptr.vmem [resolvable:$true] %s71_s22 }
  0x2f   :  { %s10937_s23 = scalar_lea.vmem %s72_s22, 512  ;;  %p10942_p7 = scmp.lt.s32.totalorder %s72_s22, %s72_s22 }
  0x30   :  { %p10938_p6 = scmp.ne.s32.totalorder %s72_s22, %s10937_s23  ;;  %p10943_p8 = scmp.lt.s32.totalorder %s10937_s23, %s10937_s23 }
  0x32   :  { %p10944_p9 = por %p10943_p8, %p10942_p7 }
  0x34   :  { %p10945_p10 = pnand %p10944_p9, %p10938_p6 }
  0x36   :  { %10948 = shalt.err (!%p10945_p10)
}
  0x37   :  { %77 = dma.hbm_to_vmem [thread:$0]  %s12087_s4, 512, %s72_s22, [#allocation9], %s11001_s29, %s11001_s29, %s11002_s30  }
  0x38   :  { %10989 = dma.done.wait [#allocation3], 256  }
  0x39   :  { %10990 = vsyncadd [#allocation3], 4294967040 }
  0x3a   :  { %10991 = dma.done.wait [#allocation6], 512  }
  0x3b   :  { %10992 = vsyncadd [#allocation6], 4294966784 }
  0x3c   :  { %10993 = dma.done.wait [#allocation9], 2048  }
  0x3d   :  { %10994 = vsyncadd [#allocation9], 4294965248  ;;  %vm105_vm0 = vcmask 261120   ;;  %v104_v0 = vld [vmem:[#allocation8 + $0x18] sm:$0xff]  ;;  %v103_v1 = vld [vmem:[#allocation8 + $0x10] sm:$0xff]  ;;  %vm11007_vm1 = vmmov 0  }
  0x3e   :  { %v102_v2 = vld [vmem:[#allocation8 + $0x8] sm:$0xff]  ;;  %v11085_v3 = vand.u32 4294901760, %v104_v0  ;;  %v11087_v4 = vand.u32 4294901760, %v103_v1  ;;  %v101_v6 = vld [vmem:[#allocation8] sm:$0xff]  ;;  %v95_v7 = vld [vmem:[#allocation2] sm:$0xff]  ;;  %vm1768_vm2 = vcmask 64512  }
  0x3f   :  { %v11089_v5 = vand.u32 4294901760, %v102_v2  ;;  %v96_v8 = vld [vmem:[#allocation2 + $0x8] sm:$0xff]  ;;  %v11091_v9 = vand.u32 4294901760, %v101_v6  ;;  %v107_v10 = vsel %vm105_vm0, %v95_v7, 0  ;;  %v97_v38 = vld [vmem:[#allocation5] sm:$0xff]  ;;  %v98_v40 = vld [vmem:[#allocation5 + $0x8] sm:$0xff] }
  0x40   :  { %v110_v11 = vsel %vm105_vm0, %v96_v8, 0  ;;  %10051 = vmatprep.subr.mxu0 %v11085_v3  ;;  %v227_v12 = vsub.f32 %v104_v0, %v11085_v3  ;;  %v11097_v13 = vand.u32 4294901760, %v107_v10  ;;  %v234_v14 = vsub.f32 %v103_v1, %v11087_v4  ;;  %v644_v39 = vld [vmem:[#allocation8 + $0x38] sm:$0xff]  ;;  %v643_v41 = vld [vmem:[#allocation8 + $0x30] sm:$0xff]  ;;  %v642_v46 = vld [vmem:[#allocation8 + $0x28] sm:$0xff]  ;;  %s11008_s2 = smov 112  }
  0x41   :  { %v11100_v15 = vand.u32 4294901760, %v110_v11  ;;  %10052 = vmatpush3.msra.mxu0 %v11085_v3  ;;  %v241_v16 = vsub.f32 %v102_v2, %v11089_v5  ;;  %v248_v17 = vsub.f32 %v101_v6, %v11091_v9  ;;  %v646_v42 = vsel %vm105_vm0, %v97_v38, 0  ;;  %v641_v49 = vld [vmem:[#allocation8 + $0x20] sm:$0xff]  ;;  %s11009_s4 = smov 120   ;;  %s11010_s25 = smov 104  }
  0x42   :  { %10053 = vmatprep.subr.mxu0 %v11087_v4  ;;  %v228_v18 = vand.u32 4294901760, %v227_v12  ;;  %v11107_v19 = vsub.f32 %v107_v10, %v11097_v13  ;;  %v11109_v20 = vand.u32 4294901760, %v234_v14  ;;  %10070 = vmatprep.mubr.f32.mxu1 %v11097_v13  ;;  %v11138_v43 = vand.u32 4294901760, %v644_v39  ;;  %s11011_s26 = smov 16   ;;  %s11012_s27 = smov 24  }
  0x43   :  { %v11112_v21 = vsub.f32 %v110_v11, %v11100_v15  ;;  %10054 = vmatpush3.msra.mxu0 %v11087_v4  ;;  %v11116_v22 = vand.u32 4294901760, %v241_v16  ;;  %v11118_v23 = vand.u32 4294901760, %v248_v17  ;;  %v649_v44 = vsel %vm105_vm0, %v98_v40, 0  ;;  %s11013_s28 = smov [#allocation12]  }
  0x44   :  { %10055 = vmatprep.subr.mxu0 %v11089_v5  ;;  %v229_v24 = vsub.f32 %v227_v12, %v228_v18  ;;  %v183_v25 = vand.u32 4294901760, %v11107_v19  ;;  %v236_v26 = vsub.f32 %v234_v14, %v11109_v20  ;;  %v11144_v45 = vand.u32 4294901760, %v643_v41  ;;  %s9694_s8 = sshll.u32 %s11013_s28, 4  ;;  %s9695_s8 = int_to_ptr.vmem [resolvable:$true] %s9694_s8 }
  0x45   :  { %v193_v27 = vand.u32 4294901760, %v11112_v21  ;;  %10056 = vmatpush3.msra.mxu0 %v11089_v5  ;;  %v243_v28 = vsub.f32 %v241_v16, %v11116_v22  ;;  %v250_v29 = vsub.f32 %v248_v17, %v11118_v23  ;;  %v11146_v47 = vand.u32 4294901760, %v646_v42  ;;  %s10949_s9 = scalar_lea.vmem %s9695_s8, 1024  ;;  %p10954_p12 = scmp.lt.s32.totalorder %s9695_s8, %s9695_s8 }
  0x46   :  { %10057 = vmatprep.subr.mxu0 %v11091_v9  ;;  %v230_v30 = vand.u32 4294901760, %v229_v24  ;;  %v184_v31 = vsub.f32 %v11107_v19, %v183_v25  ;;  %v237_v32 = vand.u32 4294901760, %v236_v26  ;;  %v11149_v48 = vand.u32 4294901760, %v649_v44  ;;  %p10950_p11 = scmp.ne.s32.totalorder %s9695_s8, %s10949_s9  ;;  %p10955_p13 = scmp.lt.s32.totalorder %s10949_s9, %s10949_s9 }
  0x47   :  { %v194_v33 = vsub.f32 %v11112_v21, %v193_v27  ;;  %10058 = vmatpush3.msra.mxu0 %v11091_v9  ;;  %v244_v36 = vand.u32 4294901760, %v243_v28  ;;  %v251_v37 = vand.u32 4294901760, %v250_v29  ;;  %v11153_v50 = vsub.f32 %v644_v39, %v11138_v43 }
  0x48   :  { %10062 = vmatprep.subr.mxu1 %v230_v30  ;;  %v185_v34 = vand.u32 4294901760, %v184_v31  ;;  %10073 = vmatprep.subr.mxu0 %v227_v12  ;;  %v11157_v51 = vand.u32 4294901760, %v642_v46  ;;  %v11162_v52 = vsub.f32 %v646_v42, %v11146_v47  ;;  %v773_v53 = vsub.f32 %v643_v41, %v11144_v45  ;;  %p10956_p0 = por %p10955_p13, %p10954_p12 }
  0x49   :  { %v195_v35 = vand.u32 4294901760, %v194_v33  ;;  %10063 = vmatpush3.msra.mxu1 %v230_v30  ;;  %v11167_v54 = vand.u32 4294901760, %v641_v49  ;;  %v11170_v55 = vsub.f32 %v649_v44, %v11149_v48  ;;  %v11176_v56 = vand.u32 4294901760, %v11153_v50 }
  0x4a   :  { %10059 = vmatprep.mubr.f32.mxu0 %v185_v34  ;;  %10064 = vmatprep.subr.mxu1 %v237_v32  ;;  %v780_v57 = vsub.f32 %v642_v46, %v11157_v51  ;;  %v722_v58 = vand.u32 4294901760, %v11162_v52  ;;  %v11185_v59 = vand.u32 4294901760, %v773_v53  ;;  %vm9083_vm3 = vcmask 130048   ;;  %p10957_p1 = pnand %p10956_p0, %p10950_p11 }
  0x4b   :  { %10060 = vmatmul.mubr.f32.vlgmr.msra.gmra.mxu0 %v195_v35  ;;  %10065 = vmatpush3.msra.mxu1 %v237_v32  ;;  %v732_v60 = vand.u32 4294901760, %v11170_v55  ;;  %v787_v61 = vsub.f32 %v641_v49, %v11167_v54  ;;  %v768_v62 = vsub.f32 %v11153_v50, %v11176_v56  ;;  %vm9086_vm4 = vcmask 195584  }
  0x4c   :  { %10074 = vmatpush3.msra.mxu0 %v227_v12  ;;  %10066 = vmatprep.subr.mxu1 %v244_v36  ;;  %v781_v63 = vand.u32 4294901760, %v780_v57  ;;  %v723_v0 = vsub.f32 %v11162_v52, %v722_v58  ;;  %v775_v1 = vsub.f32 %v773_v53, %v11185_v59  ;;  %v1183_v12 = vld [vmem:[#allocation8 + $0x58] sm:$0xff] }
  0x4d   :  { %10075 = vmatprep.subr.mxu0 %v234_v14  ;;  %10067 = vmatpush3.msra.mxu1 %v244_v36  ;;  %v733_v2 = vsub.f32 %v11170_v55, %v732_v60 }
  0x4e   :  { %10076 = vmatpush3.msra.mxu0 %v234_v14  ;;  %10068 = vmatprep.subr.mxu1 %v251_v37  ;;  %v782_v6 = vsub.f32 %v780_v57, %v781_v63  ;;  %v724_v7 = vand.u32 4294901760, %v723_v0  ;;  %v776_v8 = vand.u32 4294901760, %v775_v1  ;;  %v1182_v14 = vld [vmem:[#allocation8 + $0x50] sm:$0xff] }
  0x4f   :  { %10077 = vmatprep.subr.mxu0 %v241_v16  ;;  %10069 = vmatpush3.msra.mxu1 %v251_v37  ;;  %v734_v10 = vand.u32 4294901760, %v733_v2 }
  0x50   :  { %10078 = vmatpush3.msra.mxu0 %v241_v16  ;;  %10071 = vmatmul.mubr.f32.vlgmr.msra.gmra.mxu1 %v11100_v15  ;;  %v783_v11 = vand.u32 4294901760, %v782_v6  ;;  %v1181_v16 = vld [vmem:[#allocation8 + $0x48] sm:$0xff] }
  0x51   :  { %10079 = vmatprep.subr.mxu0 %v248_v17  ;;  %10084 = vmatprep.subr.mxu1 %v11085_v3 }
  0x52   :  { %10080 = vmatpush3.msra.mxu0 %v248_v17  ;;  %10081 = vmatprep.mubr.f32.mxu0 %v11107_v19  ;;  %v1180_v17 = vld [vmem:[#allocation8 + $0x40] sm:$0xff] }
  0x53   :  { %10085 = vmatpush3.msra.mxu1 %v11085_v3  ;;  %10082 = vmatmul.mubr.f32.vlgmr.msra.gmra.mxu0 %v11112_v21  ;;  %v11261_v19 = vand.u32 4294901760, %v1180_v17 }
  0x54   :  { %10086 = vmatprep.subr.mxu1 %v11087_v4  ;;  %10095 = vmatprep.subr.mxu0 %v228_v18 }
  0x55   :  { %10087 = vmatpush3.msra.mxu1 %v11087_v4  ;;  %10096 = vmatpush3.msra.mxu0 %v228_v18  ;;  %v11259_v18 = vand.u32 4294901760, %v1181_v16  ;;  %v1326_v38 = vsub.f32 %v1180_v17, %v11261_v19 }
  0x56   :  { %10088 = vmatprep.subr.mxu1 %v11089_v5  ;;  %10097 = vmatprep.subr.mxu0 %v11109_v20 }
  0x57   :  { %10089 = vmatpush3.msra.mxu1 %v11089_v5  ;;  %10098 = vmatpush3.msra.mxu0 %v11109_v20  ;;  %v99_v20 = vld [vmem:[#allocation7] sm:$0xff]  ;;  %v1319_v36 = vsub.f32 %v1181_v16, %v11259_v18  ;;  %v1327_v44 = vand.u32 4294901760, %v1326_v38 }
  0x58   :  { %10090 = vmatprep.subr.mxu1 %v11091_v9  ;;  %10099 = vmatprep.subr.mxu0 %v11116_v22  ;;  %v1185_v21 = vsel %vm105_vm0, %v99_v20, 0 }
  0x59   :  { %10091 = vmatpush3.msra.mxu1 %v11091_v9  ;;  %10092 = vmatprep.mubr.f32.mxu1 %v183_v25  ;;  %v1320_v42 = vand.u32 4294901760, %v1319_v36 }
  0x5a   :  { %10100 = vmatpush3.msra.mxu0 %v11116_v22  ;;  %10093 = vmatmul.mubr.f32.vlgmr.msra.gmra.mxu1 %v193_v27  ;;  %v100_v22 = vld [vmem:[#allocation7 + $0x8] sm:$0xff] }
  0x5b   :  { %10101 = vmatprep.subr.mxu0 %v11118_v23  ;;  %10106 = vmatprep.subr.mxu1 %v11085_v3  ;;  %v1188_v24 = vsel %vm105_vm0, %v100_v22, 0  ;;  %v1321_v46 = vsub.f32 %v1319_v36, %v1320_v42 }
  0x5c   :  { %10102 = vmatpush3.msra.mxu0 %v11118_v23  ;;  %10103 = vmatprep.mubr.f32.mxu0 %v11097_v13  ;;  %v11266_v23 = vand.u32 4294901760, %v1185_v21  ;;  %v11270_v25 = vand.u32 4294901760, %v1188_v24 }
  0x5d   :  { %10107 = vmatpush3.msra.mxu1 %v11085_v3  ;;  %10104 = vmatmul.mubr.f32.vlgmr.msra.gmra.mxu0 %v11100_v15  ;;  %v788_v3 = vand.u32 4294901760, %v787_v61 }
  0x5e   :  { %10108 = vmatprep.subr.mxu1 %v11087_v4  ;;  %10117 = vmatprep.subr.mxu0 %v11138_v43  ;;  %v11274_v26 = vsub.f32 %v1185_v21, %v11266_v23  ;;  %v11280_v28 = vsub.f32 %v1188_v24, %v11270_v25 }
  0x5f   :  { %10109 = vmatpush3.msra.mxu1 %v11087_v4  ;;  %10118 = vmatpush3.msra.mxu0 %v11138_v43  ;;  %v769_v4 = vand.u32 4294901760, %v768_v62 }
  0x60   :  { %10110 = vmatprep.subr.mxu1 %v11089_v5  ;;  %10119 = vmatprep.subr.mxu0 %v11144_v45  ;;  %v1261_v29 = vand.u32 4294901760, %v11274_v26  ;;  %v1271_v32 = vand.u32 4294901760, %v11280_v28 }
  0x61   :  { %10111 = vmatpush3.msra.mxu1 %v11089_v5  ;;  %10120 = vmatpush3.msra.mxu0 %v11144_v45  ;;  %v789_v5 = vsub.f32 %v787_v61, %v788_v3 }
  0x62   :  { %10112 = vmatprep.subr.mxu1 %v11091_v9  ;;  %10121 = vmatprep.subr.mxu0 %v11157_v51  ;;  %v1262_v33 = vsub.f32 %v11274_v26, %v1261_v29  ;;  %v1272_v37 = vsub.f32 %v11280_v28, %v1271_v32 }
  0x63   :  { %10113 = vmatpush3.msra.mxu1 %v11091_v9  ;;  %10114 = vmatprep.mubr.f32.mxu1 %v11097_v13  ;;  %v790_v9 = vand.u32 4294901760, %v789_v5  ;;  %v11252_v13 = vand.u32 4294901760, %v1183_v12 }
  0x64   :  { %10122 = vmatpush3.msra.mxu0 %v11157_v51  ;;  %10115 = vmatmul.mubr.f32.vlgmr.msra.gmra.mxu1 %v11100_v15  ;;  %v11256_v15 = vand.u32 4294901760, %v1182_v14  ;;  %v1263_v39 = vand.u32 4294901760, %v1262_v33 }
  0x65   :  { %10123 = vmatprep.subr.mxu0 %v11167_v54  ;;  %10128 = vmatprep.subr.mxu1 %v769_v4  ;;  %v1305_v27 = vsub.f32 %v1183_v12, %v11252_v13 }
  0x66   :  { %10124 = vmatpush3.msra.mxu0 %v11167_v54  ;;  %10129 = vmatpush3.msra.mxu1 %v769_v4  ;;  %v1312_v31 = vsub.f32 %v1182_v14, %v11256_v15 }
  0x67   :  { %10125 = vmatprep.mubr.f32.mxu0 %v724_v7  ;;  %10130 = vmatprep.subr.mxu1 %v776_v8  ;;  %v1306_v30 = vand.u32 4294901760, %v1305_v27 }
  0x68   :  { %10139 = vmatprep.subr.mxu0 %v11153_v50  ;;  %10126 = vmatmul.mubr.f32.vlgmr.msra.gmra.mxu0 %v734_v10  ;;  %v1313_v35 = vand.u32 4294901760, %v1312_v31 }
  0x69   :  { %10131 = vmatpush3.msra.mxu1 %v776_v8  ;;  %10140 = vmatpush3.msra.mxu0 %v11153_v50  ;;  %v1307_v34 = vsub.f32 %v1305_v27, %v1306_v30  ;;  %v11006_v50 = vmov 0.0  }
  0x6a   :  { %10132 = vmatprep.subr.mxu1 %v783_v11  ;;  %10141 = vmatprep.subr.mxu0 %v773_v53  ;;  %v1314_v41 = vsub.f32 %v1312_v31, %v1313_v35 }
  0x6b   :  { %10133 = vmatpush3.msra.mxu1 %v783_v11  ;;  %10142 = vmatpush3.msra.mxu0 %v773_v53  ;;  %v1308_v40 = vand.u32 4294901760, %v1307_v34 }
  0x6c   :  { %10134 = vmatprep.subr.mxu1 %v790_v9  ;;  %10143 = vmatprep.subr.mxu0 %v780_v57 }
  0x6d   :  { %10135 = vmatpush3.msra.mxu1 %v790_v9  ;;  %10136 = vmatprep.mubr.f32.mxu1 %v11146_v47 }
  0x6e   :  { %10144 = vmatpush3.msra.mxu0 %v780_v57  ;;  %10137 = vmatmul.mubr.f32.vlgmr.msra.gmra.mxu1 %v11149_v48 }
  0x6f   :  { %10145 = vmatprep.subr.mxu0 %v787_v61  ;;  %10150 = vmatprep.subr.mxu1 %v11138_v43 }
  0x70   :  { %10146 = vmatpush3.msra.mxu0 %v787_v61  ;;  %10147 = vmatprep.mubr.f32.mxu0 %v11162_v52 }
  0x71   :  { %10151 = vmatpush3.msra.mxu1 %v11138_v43  ;;  %10148 = vmatmul.mubr.f32.vlgmr.msra.gmra.mxu0 %v11170_v55 }
  0x72   :  { %10152 = vmatprep.subr.mxu1 %v11144_v45  ;;  %10161 = vmatprep.subr.mxu0 %v11176_v56 }
  0x73   :  { %10153 = vmatpush3.msra.mxu1 %v11144_v45  ;;  %10162 = vmatpush3.msra.mxu0 %v11176_v56 }
  0x74   :  { %10154 = vmatprep.subr.mxu1 %v11157_v51  ;;  %10163 = vmatprep.subr.mxu0 %v11185_v59 }
  0x75   :  { %10155 = vmatpush3.msra.mxu1 %v11157_v51  ;;  %10164 = vmatpush3.msra.mxu0 %v11185_v59 }
  0x76   :  { %10156 = vmatprep.subr.mxu1 %v11167_v54  ;;  %10165 = vmatprep.subr.mxu0 %v781_v63 }
  0x77   :  { %10157 = vmatpush3.msra.mxu1 %v11167_v54  ;;  %10158 = vmatprep.mubr.f32.mxu1 %v722_v58 }
  0x78   :  { %10166 = vmatpush3.msra.mxu0 %v781_v63  ;;  %10159 = vmatmul.mubr.f32.vlgmr.msra.gmra.mxu1 %v732_v60 }
  0x79   :  { %10167 = vmatprep.subr.mxu0 %v788_v3  ;;  %10172 = vmatprep.subr.mxu1 %v11138_v43 }
  0x7a   :  { %10168 = vmatpush3.msra.mxu0 %v788_v3  ;;  %10169 = vmatprep.mubr.f32.mxu0 %v11146_v47 }
  0x7b   :  { %10173 = vmatpush3.msra.mxu1 %v11138_v43  ;;  %10170 = vmatmul.mubr.f32.vlgmr.msra.gmra.mxu0 %v11149_v48  ;;  %v1273_v43 = vand.u32 4294901760, %v1272_v37 }
  0x7c   :  { %10174 = vmatprep.subr.mxu1 %v11144_v45  ;;  %10180 = vmatprep.mubr.f32.mxu1 %v11146_v47  ;;  %v1328_v47 = vsub.f32 %v1326_v38, %v1327_v44 }
  0x7d   :  { %10175 = vmatpush3.msra.mxu1 %v11144_v45  ;;  %10183 = vmatprep.subr.mxu0 %v11252_v13  ;;  %v1315_v45 = vand.u32 4294901760, %v1314_v41 }
  0x7e   :  { %10176 = vmatprep.subr.mxu1 %v11157_v51  ;;  %10184 = vmatpush3.msra.mxu0 %v11252_v13  ;;  %v1329_v49 = vand.u32 4294901760, %v1328_v47 }
  0x7f   :  { %10177 = vmatpush3.msra.mxu1 %v11157_v51  ;;  %10185 = vmatprep.subr.mxu0 %v11256_v15 }
  0x80   :  { %10178 = vmatprep.subr.mxu1 %v11167_v54  ;;  %10186 = vmatpush3.msra.mxu0 %v11256_v15 }
  0x81   :  { %10179 = vmatpush3.msra.mxu1 %v11167_v54  ;;  %10187 = vmatprep.subr.mxu0 %v11259_v18 }
  0x82   :  { %10181 = vmatmul.mubr.f32.vlgmr.msra.gmra.mxu1 %v11149_v48  ;;  %10188 = vmatpush3.msra.mxu0 %v11259_v18  ;;  %v1322_v48 = vand.u32 4294901760, %v1321_v46 }
  0x83   :  { %10189 = vmatprep.subr.mxu0 %v11261_v19  ;;  %10202 = vmatprep.mubr.f32.mxu1 %v11266_v23 }
  0x84   :  { %10190 = vmatpush3.msra.mxu0 %v11261_v19  ;;  %10191 = vmatprep.mubr.f32.mxu0 %v1263_v39 }
  0x85   :  { %10205 = vmatprep.subr.mxu0 %v1305_v27  ;;  %10194 = vmatprep.subr.mxu1 %v1308_v40 }
  0x86   :  { %10192 = vmatmul.mubr.f32.vlgmr.msra.gmra.mxu0 %v1273_v43  ;;  %10195 = vmatpush3.msra.mxu1 %v1308_v40 }
  0x87   :  { %10206 = vmatpush3.msra.mxu0 %v1305_v27  ;;  %10196 = vmatprep.subr.mxu1 %v1315_v45 }
  0x88   :  { %10207 = vmatprep.subr.mxu0 %v1312_v31  ;;  %10197 = vmatpush3.msra.mxu1 %v1315_v45 }
  0x89   :  { %10208 = vmatpush3.msra.mxu0 %v1312_v31  ;;  %10198 = vmatprep.subr.mxu1 %v1322_v48 }
  0x8a   :  { %10209 = vmatprep.subr.mxu0 %v1319_v36  ;;  %10199 = vmatpush3.msra.mxu1 %v1322_v48 }
  0x8b   :  { %10210 = vmatpush3.msra.mxu0 %v1319_v36  ;;  %10200 = vmatprep.subr.mxu1 %v1329_v49 }
  0x8c   :  { %10211 = vmatprep.subr.mxu0 %v1326_v38  ;;  %10201 = vmatpush3.msra.mxu1 %v1329_v49 }
  0x8d   :  { %10212 = vmatpush3.msra.mxu0 %v1326_v38  ;;  %10213 = vmatprep.mubr.f32.mxu0 %v11274_v26 }
  0x8e   :  { %10216 = vmatprep.subr.mxu1 %v11252_v13  ;;  %10227 = vmatprep.subr.mxu0 %v1306_v30 }
  0x8f   :  { %10203 = vmatmul.mubr.f32.vlgmr.msra.gmra.mxu1 %v11270_v25  ;;  %10214 = vmatmul.mubr.f32.vlgmr.msra.gmra.mxu0 %v11280_v28 }
  0x90   :  { %10217 = vmatpush3.msra.mxu1 %v11252_v13  ;;  %10228 = vmatpush3.msra.mxu0 %v1306_v30 }
  0x91   :  { %10218 = vmatprep.subr.mxu1 %v11256_v15  ;;  %10229 = vmatprep.subr.mxu0 %v1313_v35 }
  0x92   :  { %10219 = vmatpush3.msra.mxu1 %v11256_v15  ;;  %10230 = vmatpush3.msra.mxu0 %v1313_v35 }
  0x93   :  { %10220 = vmatprep.subr.mxu1 %v11259_v18  ;;  %10231 = vmatprep.subr.mxu0 %v1320_v42 }
  0x94   :  { %10221 = vmatpush3.msra.mxu1 %v11259_v18  ;;  %10232 = vmatpush3.msra.mxu0 %v1320_v42 }
  0x95   :  { %10222 = vmatprep.subr.mxu1 %v11261_v19  ;;  %10233 = vmatprep.subr.mxu0 %v1327_v44 }
  0x96   :  { %10223 = vmatpush3.msra.mxu1 %v11261_v19  ;;  %10234 = vmatpush3.msra.mxu0 %v1327_v44 }
  0x97   :  { %10224 = vmatprep.mubr.f32.mxu1 %v1261_v29  ;;  %10235 = vmatprep.mubr.f32.mxu0 %v11266_v23 }
  0x98   :  { %10238 = vmatprep.subr.mxu1 %v11252_v13  ;;  %10249 = vmatprep.subr.mxu0 %v11006_v50 }
  0x99   :  { %10225 = vmatmul.mubr.f32.vlgmr.msra.gmra.mxu1 %v1271_v32  ;;  %10236 = vmatmul.mubr.f32.vlgmr.msra.gmra.mxu0 %v11270_v25 }
  0x9a   :  { %10239 = vmatpush3.msra.mxu1 %v11252_v13  ;;  %10246 = vmatprep.mubr.f32.mxu1 %v11266_v23 }
  0x9b   :  { %10240 = vmatprep.subr.mxu1 %v11256_v15  ;;  %10251 = vmatprep.mubr.msk.f32.mxu0 %vm11007_vm1, %v11006_v50 }
  0x9c   :  { %10241 = vmatpush3.msra.mxu1 %v11256_v15 }
  0x9d   :  { %10242 = vmatprep.subr.mxu1 %v11259_v18 }
  0x9e   :  { %10243 = vmatpush3.msra.mxu1 %v11259_v18 }
  0x9f   :  { %10244 = vmatprep.subr.mxu1 %v11261_v19 }
  0xa0   :  { %10245 = vmatpush3.msra.mxu1 %v11261_v19 }
  0xa1   :  { %10254 = vmatprep.subr.mxu1 %v11006_v50  ;;  %10247 = vmatmul.mubr.f32.vlgmr.msra.gmra.mxu1 %v11270_v25 }
  0xa2   :  { %10256 = vmatprep.mubr.msk.f32.mxu1 %vm11007_vm1, %v11006_v50 }
 0x10b   :  { %v10061_v51 = vpop.f32.mrf.mxu0 }
 0x10d   :  { %v187_v52 = vpop.f32.mrf.mxu0 }
 0x110   :  { %v10072_v53 = vpop.f32.mrf.mxu1 }
 0x111   :  { %v295_v22 = vadd.f32 %v10072_v53, %v10061_v51 }
 0x112   :  { %v288_v54 = vpop.f32.mrf.mxu1 }
 0x113   :  { %v10083_v55 = vpop.f32.mrf.mxu0  ;;  %v289_v57 = vadd.f32 %v288_v54, %v187_v52 }
 0x114   :  { %v382_v26 = vadd.f32 %v10083_v55, %v295_v22 }
 0x115   :  { %v374_v58 = vpop.f32.mrf.mxu0 }
 0x116   :  { %v375_v61 = vadd.f32 %v374_v58, %v289_v57 }
 0x11a   :  { %v10094_v56 = vpop.f32.mrf.mxu1 }
 0x11b   :  { %v467_v29 = vadd.f32 %v10094_v56, %v382_v26 }
 0x11c   :  { %v458_v59 = vpop.f32.mrf.mxu1 }
 0x11d   :  { %v10105_v60 = vpop.f32.mrf.mxu0  ;;  %v459_v62 = vadd.f32 %v458_v59, %v375_v61 }
 0x11e   :  { %v556_v35 = vadd.f32 %v10105_v60, %v467_v29 }
 0x11f   :  { %v549_v63 = vpop.f32.mrf.mxu0 }
 0x120   :  { %v550_v1 = vadd.f32 %v549_v63, %v459_v62 }
 0x124   :  { %v10116_v0 = vpop.f32.mrf.mxu1 }
 0x125   :  { %v637_v37 = vadd.f32 %v10116_v0, %v556_v35 }
 0x126   :  { %v630_v2 = vpop.f32.mrf.mxu1 }
 0x127   :  { %v631_v3 = vadd.f32 %v630_v2, %v550_v1  ;;  %v11337_v42 = vmul.f32 0.35355338, %v637_v37 }
 0x128   :  { %v10127_v8 = vpop.f32.mrf.mxu0 }
 0x129   :  { %v1718_v4 = vmul.f32 0.35355338, %v631_v3 }
 0x12a   :  { %v726_v11 = vpop.f32.mrf.mxu0 }
 0x12b   :  { %1726 = vrot.lane.b32.xlu1 %v1718_v4, %s11008_s2  ;;  %1722 = vrot.lane.b32.xlu0 %v1718_v4, %s11009_s4  ;;  %v1771_v6 = vsel %vm1768_vm2, %v1718_v4, 0 }
 0x12c   :  { %v1804_v7 = vand.u32 4294901760, %v1771_v6 }
 0x12e   :  { %10250 = vmatpush3.xpose.msra.mxu0 %v1804_v7  ;;  %v11321_v10 = vsub.f32 %v1771_v6, %v1804_v7  ;;  %v10138_v9 = vpop.f32.mrf.mxu1 }
 0x12f   :  { %10259 = vmatprep.subr.mxu0 %v11006_v50  ;;  %v834_v25 = vadd.f32 %v10138_v9, %v10127_v8 }
 0x130   :  { %v1882_v5 = vand.u32 4294901760, %v11321_v10  ;;  %v827_v14 = vpop.f32.mrf.mxu1 }
 0x131   :  { %v10149_v15 = vpop.f32.mrf.mxu0  ;;  %v828_v17 = vadd.f32 %v827_v14, %v726_v11 }
 0x132   :  { %v1883_v12 = vsub.f32 %v11321_v10, %v1882_v5  ;;  %v921_v31 = vadd.f32 %v10149_v15, %v834_v25 }
 0x133   :  { %v913_v18 = vpop.f32.mrf.mxu0 }
 0x134   :  { %v1884_v13 = vand.u32 4294901760, %v1883_v12  ;;  %v914_v21 = vadd.f32 %v913_v18, %v828_v17 }
 0x136   :  { %10255 = vmatpush3.xpose.msra.mxu1 %v1884_v13 }
 0x137   :  { %10264 = vmatprep.subr.mxu1 %v11006_v50 }
 0x138   :  { %v10160_v16 = vpop.f32.mrf.mxu1 }
 0x139   :  { %v1006_v33 = vadd.f32 %v10160_v16, %v921_v31 }
 0x13a   :  { %v997_v19 = vpop.f32.mrf.mxu1 }
 0x13b   :  { %v10171_v20 = vpop.f32.mrf.mxu0  ;;  %v998_v23 = vadd.f32 %v997_v19, %v914_v21 }
 0x13c   :  { %v1095_v39 = vadd.f32 %v10171_v20, %v1006_v33 }
 0x13d   :  { %v1088_v24 = vpop.f32.mrf.mxu0 }
 0x13e   :  { %v1089_v28 = vadd.f32 %v1088_v24, %v998_v23 }
 0x142   :  { %v10182_v27 = vpop.f32.mrf.mxu1 }
 0x143   :  { %v11334_v41 = vadd.f32 %v10182_v27, %v1095_v39 }
 0x144   :  { %v1169_v30 = vpop.f32.mrf.mxu1 }
 0x145   :  { %v1170_v32 = vadd.f32 %v1169_v30, %v1089_v28  ;;  %v3571_v30 = vsel %vm1768_vm2, %v11337_v42, 0 }
 0x146   :  { %v10193_v47 = vpop.f32.mrf.mxu0  ;;  %v11418_v33 = vand.u32 4294901760, %v3571_v30 }
 0x147   :  { %1740 = vrot.lane.b32.xlu1 %v1170_v32, %s11008_s2  ;;  %1736 = vrot.lane.b32.xlu0 %v1170_v32, %s11009_s4  ;;  %v1769_v34 = vsel %vm1768_vm2, %v1170_v32, 0 }
 0x148   :  { %v1839_v36 = vand.u32 4294901760, %v1769_v34  ;;  %v11367_v49 = vpop.f32.mrf.mxu0  ;;  %v11431_v37 = vsub.f32 %v3571_v30, %v11418_v33 }
 0x14a   :  { %v1840_v38 = vsub.f32 %v1769_v34, %v1839_v36  ;;  %10257 = vmatmul.mubr.f32.vlgmr.msra.gmra.mxu1 %v1839_v36 }
 0x14b   :  { %10265 = vmatpush3.xpose.msra.mxu1 %v1804_v7  ;;  %1744 = vrot.lane.b32.xlu1 %v1170_v32, %s11010_s25 }
 0x14c   :  { %1730 = vrot.lane.b32.xlu0 %v1718_v4, %s11010_s25  ;;  %10266 = vmatprep.mubr.msk.f32.mxu1 %vm11007_vm1, %v11006_v50  ;;  %v1841_v40 = vand.u32 4294901760, %v1840_v38 }
 0x14d   :  { %10274 = vmatprep.subr.mxu1 %v11006_v50 }
 0x14e   :  { %10267 = vmatmul.mubr.f32.vlgmr.msra.gmra.mxu1 %v1841_v40  ;;  %v1842_v43 = vsub.f32 %v1840_v38, %v1841_v40 }
 0x14f   :  { %10275 = vmatpush3.xpose.msra.mxu1 %v1804_v7  ;;  %1738 = vrot.lane.b32.xlu1 %v11334_v41, %s11009_s4  ;;  %v10204_v45 = vpop.f32.mrf.mxu1  ;;  %v10215_v52 = vpop.f32.mrf.mxu0 }
 0x150   :  { %1724 = vrot.lane.b32.xlu0 %v11337_v42, %s11009_s4  ;;  %10276 = vmatprep.mubr.msk.f32.mxu1 %vm11007_vm1, %v11006_v50  ;;  %v1843_v44 = vand.u32 4294901760, %v1842_v43  ;;  %v1373_v48 = vadd.f32 %v10204_v45, %v10193_v47  ;;  %v3569_v43 = vsel %vm1768_vm2, %v11334_v41, 0 }
 0x151   :  { %10284 = vmatprep.subr.mxu1 %v11006_v50  ;;  %v11365_v46 = vpop.f32.mrf.mxu1  ;;  %v11369_v54 = vpop.f32.mrf.mxu0  ;;  %v11455_v47 = vand.u32 4294901760, %v3569_v43 }
 0x152   :  { %10252 = vmatmul.mubr.f32.vlgmr.msra.gmra.mxu0 %v1843_v44  ;;  %10277 = vmatmul.mubr.f32.vlgmr.msra.gmra.mxu1 %v1839_v36  ;;  %v1460_v53 = vadd.f32 %v10215_v52, %v1373_v48 }
 0x153   :  { %10260 = vmatpush3.xpose.msra.mxu0 %v11321_v10  ;;  %1742 = vrot.lane.b32.xlu1 %v11334_v41, %s11008_s2  ;;  %v3640_v52 = vsub.f32 %v3569_v43, %v11455_v47 }
 0x154   :  { %1728 = vrot.lane.b32.xlu0 %v11337_v42, %s11008_s2  ;;  %10261 = vmatprep.mubr.msk.f32.mxu0 %vm11007_vm1, %v11006_v50 }
 0x155   :  { %10269 = vmatprep.subr.mxu0 %v11006_v50  ;;  %10286 = vmatprep.mubr.msk.f32.mxu1 %vm11007_vm1, %v11006_v50 }
 0x156   :  { %10262 = vmatmul.mubr.f32.vlgmr.msra.gmra.mxu0 %v1840_v38 }
 0x157   :  { %10270 = vmatpush3.xpose.msra.mxu0 %v1882_v5  ;;  %1746 = vrot.lane.b32.xlu1 %v11334_v41, %s11010_s25 }
 0x158   :  { %1732 = vrot.lane.b32.xlu0 %v11337_v42, %s11010_s25  ;;  %10271 = vmatprep.mubr.msk.f32.mxu0 %vm11007_vm1, %v11006_v50  ;;  %v3682_v42 = vand.u32 4294901760, %v11431_v37 }
 0x159   :  { %10279 = vmatprep.subr.mxu0 %v11006_v50  ;;  %v10226_v51 = vpop.f32.mrf.mxu1  ;;  %v10237_v57 = vpop.f32.mrf.mxu0 }
 0x15a   :  { %10272 = vmatmul.mubr.f32.vlgmr.msra.gmra.mxu0 %v1839_v36  ;;  %v1545_v56 = vadd.f32 %v10226_v51, %v1460_v53  ;;  %v3683_v41 = vsub.f32 %v11431_v37, %v3682_v42 }
 0x15b   :  { %10281 = vmatprep.mubr.msk.f32.mxu0 %vm11007_vm1, %v11006_v50  ;;  %v11371_v55 = vpop.f32.mrf.mxu1 }
 0x15c   :  { %v1634_v58 = vadd.f32 %v10237_v57, %v1545_v56  ;;  %v3684_v56 = vand.u32 4294901760, %v3683_v41 }
 0x161   :  { %v10248_v59 = vpop.f32.mrf.mxu1 }
 0x162   :  { %v11373_v60 = vadd.f32 %v10248_v59, %v1634_v58  ;;  %v3641_v59 = vand.u32 4294901760, %v3640_v52 }
 0x19d   :  { %v1723_v61 = vpop.permute.xlu0 %1722  ;;  %v1727_v4 = vpop.permute.xlu1 %1726 }
 0x19e   :  { %v2221_v62 = vsel %vm1768_vm2, %v1723_v61, 0  ;;  %v2671_v6 = vsel %vm1768_vm2, %v1727_v4, 0 }
 0x19f   :  { %v2254_v63 = vand.u32 4294901760, %v2221_v62  ;;  %v2704_v7 = vand.u32 4294901760, %v2671_v6 }
 0x1a1   :  { %v2331_v0 = vsub.f32 %v2221_v62, %v2254_v63  ;;  %10280 = vmatpush3.xpose.msra.mxu0 %v2254_v63  ;;  %v11379_v8 = vsub.f32 %v2671_v6, %v2704_v7 }
 0x1a2   :  { %10289 = vmatprep.subr.mxu0 %v11006_v50 }
 0x1a3   :  { %v2332_v1 = vand.u32 4294901760, %v2331_v0  ;;  %v2782_v12 = vand.u32 4294901760, %v11379_v8 }
 0x1a5   :  { %v2333_v2 = vsub.f32 %v2331_v0, %v2332_v1  ;;  %v2783_v19 = vsub.f32 %v11379_v8, %v2782_v12 }
 0x1a7   :  { %v2334_v3 = vand.u32 4294901760, %v2333_v2  ;;  %v2784_v24 = vand.u32 4294901760, %v2783_v19 }
 0x1a9   :  { %10285 = vmatpush3.xpose.msra.mxu1 %v2334_v3 }
 0x1aa   :  { %10294 = vmatprep.subr.mxu1 %v11006_v50 }
 0x1b9   :  { %v1741_v10 = vpop.permute.xlu1 %1740  ;;  %v1737_v5 = vpop.permute.xlu0 %1736 }
 0x1ba   :  { %v2219_v11 = vsel %vm1768_vm2, %v1737_v5, 0  ;;  %v2669_v13 = vsel %vm1768_vm2, %v1741_v10, 0 }
 0x1bb   :  { %v2289_v9 = vand.u32 4294901760, %v2219_v11  ;;  %v11386_v16 = vand.u32 4294901760, %v2669_v13 }
 0x1bd   :  { %v2290_v14 = vsub.f32 %v2219_v11, %v2289_v9  ;;  %10287 = vmatmul.mubr.f32.vlgmr.msra.gmra.mxu1 %v2289_v9  ;;  %v2740_v22 = vsub.f32 %v2669_v13, %v11386_v16  ;;  %v1745_v26 = vpop.permute.xlu1 %1744 }
 0x1be   :  { %v1731_v15 = vpop.permute.xlu0 %1730  ;;  %10295 = vmatpush3.xpose.msra.mxu1 %v2254_v63  ;;  %10296 = vmatprep.mubr.msk.f32.mxu1 %vm11007_vm1, %v11006_v50  ;;  %v3119_v28 = vsel %vm1768_vm2, %v1745_v26, 0 }
 0x1bf   :  { %v2291_v17 = vand.u32 4294901760, %v2290_v14  ;;  %v3121_v18 = vsel %vm1768_vm2, %v1731_v15, 0  ;;  %10304 = vmatprep.subr.mxu1 %v11006_v50  ;;  %v2741_v27 = vand.u32 4294901760, %v2740_v22  ;;  %v11413_v32 = vand.u32 4294901760, %v3119_v28 }
 0x1c0   :  { %v11393_v20 = vand.u32 4294901760, %v3121_v18 }
 0x1c1   :  { %v2292_v21 = vsub.f32 %v2290_v14, %v2291_v17  ;;  %10297 = vmatmul.mubr.f32.vlgmr.msra.gmra.mxu1 %v2291_v17  ;;  %v2742_v31 = vsub.f32 %v2740_v22, %v2741_v27  ;;  %v3190_v36 = vsub.f32 %v3119_v28, %v11413_v32  ;;  %v1739_v57 = vpop.permute.xlu1 %1738 }
 0x1c2   :  { %10305 = vmatpush3.xpose.msra.mxu1 %v2254_v63  ;;  %10306 = vmatprep.mubr.msk.f32.mxu1 %vm11007_vm1, %v11006_v50  ;;  %v11400_v25 = vsub.f32 %v3121_v18, %v11393_v20  ;;  %v1725_v39 = vpop.permute.xlu0 %1724  ;;  %v4019_v61 = vsel %vm1768_vm2, %v1739_v57, 0  ;;  %v1627_v18 = vpop.f32.mrf.mxu0 }
 0x1c3   :  { %v2293_v23 = vand.u32 4294901760, %v2292_v21  ;;  %10314 = vmatprep.subr.mxu1 %v11006_v50  ;;  %v2743_v35 = vand.u32 4294901760, %v2742_v31  ;;  %v3191_v40 = vand.u32 4294901760, %v3190_v36  ;;  %v4021_v44 = vsel %vm1768_vm2, %v1725_v39, 0 }
 0x1c4   :  { %v3232_v29 = vand.u32 4294901760, %v11400_v25  ;;  %v11457_v48 = vand.u32 4294901760, %v4021_v44 }
 0x1c5   :  { %10282 = vmatmul.mubr.f32.vlgmr.msra.gmra.mxu0 %v2293_v23  ;;  %10307 = vmatmul.mubr.f32.vlgmr.msra.gmra.mxu1 %v2289_v9  ;;  %v3192_v45 = vsub.f32 %v3190_v36, %v3191_v40  ;;  %v1743_v5 = vpop.permute.xlu1 %1742 }
 0x1c6   :  { %10290 = vmatpush3.xpose.msra.mxu0 %v2331_v0  ;;  %10315 = vmatpush3.xpose.msra.mxu1 %v2784_v24  ;;  %v3233_v34 = vsub.f32 %v11400_v25, %v3232_v29  ;;  %v11473_v53 = vsub.f32 %v4021_v44, %v11457_v48  ;;  %v1729_v58 = vpop.permute.xlu0 %1728  ;;  %v11493_v0 = vand.u32 4294901760, %v4019_v61  ;;  %v1708_v24 = vpop.f32.mrf.mxu1 }
 0x1c7   :  { %10291 = vmatprep.mubr.msk.f32.mxu0 %vm11007_vm1, %v11006_v50  ;;  %10299 = vmatprep.subr.mxu0 %v11006_v50  ;;  %v3193_v51 = vand.u32 4294901760, %v3192_v45  ;;  %v4471_v63 = vsel %vm1768_vm2, %v1729_v58, 0 }
 0x1c8   :  { %10316 = vmatprep.mubr.msk.f32.mxu1 %vm11007_vm1, %v11006_v50  ;;  %10324 = vmatprep.subr.mxu1 %v11006_v50  ;;  %v3234_v38 = vand.u32 4294901760, %v3233_v34  ;;  %v4132_v62 = vand.u32 4294901760, %v11473_v53  ;;  %v11501_v3 = vand.u32 4294901760, %v4471_v63  ;;  %v11510_v4 = vsub.f32 %v4019_v61, %v11493_v0 }
 0x1c9   :  { %10292 = vmatmul.mubr.f32.vlgmr.msra.gmra.mxu0 %v2290_v14  ;;  %10317 = vmatmul.mubr.f32.vlgmr.msra.gmra.mxu1 %v11386_v16  ;;  %v1747_v23 = vpop.permute.xlu1 %1746 }
 0x1ca   :  { %10300 = vmatpush3.xpose.msra.mxu0 %v2332_v1  ;;  %10325 = vmatpush3.xpose.msra.mxu1 %v2704_v7  ;;  %v3642_v1 = vsub.f32 %v3640_v52, %v3641_v59  ;;  %v4133_v2 = vsub.f32 %v11473_v53, %v4132_v62  ;;  %v11518_v10 = vsub.f32 %v4471_v63, %v11501_v3  ;;  %v1733_v11 = vpop.permute.xlu0 %1732 }
 0x1cb   :  { %10301 = vmatprep.mubr.msk.f32.mxu0 %vm11007_vm1, %v11006_v50  ;;  %10309 = vmatprep.subr.mxu0 %v11006_v50  ;;  %v4921_v13 = vsel %vm1768_vm2, %v1733_v11, 0 }
 0x1cc   :  { %10326 = vmatprep.mubr.msk.f32.mxu1 %vm11007_vm1, %v11006_v50  ;;  %10334 = vmatprep.subr.mxu1 %v11006_v50  ;;  %v3643_v6 = vand.u32 4294901760, %v3642_v1  ;;  %v11550_v17 = vand.u32 4294901760, %v4921_v13 }
 0x1cd   :  { %10302 = vmatmul.mubr.f32.vlgmr.msra.gmra.mxu0 %v2289_v9  ;;  %10327 = vmatmul.mubr.f32.vlgmr.msra.gmra.mxu1 %v2741_v27  ;;  %v4091_v9 = vand.u32 4294901760, %v11510_v4  ;;  %v4919_v27 = vsel %vm1768_vm2, %v1747_v23, 0 }
 0x1ce   :  { %10310 = vmatpush3.xpose.msra.mxu0 %v2704_v7  ;;  %10335 = vmatpush3.xpose.msra.mxu1 %v2704_v7  ;;  %v1367_v7 = vadd.f32 %v11365_v46, %v11367_v49  ;;  %v4469_v49 = vsel %vm1768_vm2, %v1743_v5, 0  ;;  %v11585_v30 = vand.u32 4294901760, %v4919_v27 }
 0x1cf   :  { %10311 = vmatprep.mubr.msk.f32.mxu0 %vm11007_vm1, %v11006_v50  ;;  %10319 = vmatprep.subr.mxu0 %v11006_v50  ;;  %v11541_v14 = vand.u32 4294901760, %v4469_v49 }
 0x1d0   :  { %10336 = vmatprep.mubr.msk.f32.mxu1 %vm11007_vm1, %v11006_v50  ;;  %10344 = vmatprep.subr.mxu1 %v11006_v50  ;;  %v1453_v46 = vadd.f32 %v11369_v54, %v1367_v7  ;;  %v4092_v54 = vsub.f32 %v11510_v4, %v4091_v9  ;;  %v4990_v34 = vsub.f32 %v4919_v27, %v11585_v30 }
 0x1d1   :  { %10312 = vmatmul.mubr.f32.vlgmr.msra.gmra.mxu0 %v2743_v35  ;;  %10337 = vmatmul.mubr.f32.vlgmr.msra.gmra.mxu1 %v11386_v16  ;;  %v4540_v19 = vsub.f32 %v4469_v49, %v11541_v14 }
 0x1d2   :  { %10320 = vmatpush3.xpose.msra.mxu0 %v11379_v8  ;;  %10345 = vmatpush3.xpose.msra.mxu1 %v3234_v38  ;;  %v4134_v8 = vand.u32 4294901760, %v4133_v2  ;;  %v1537_v15 = vadd.f32 %v11371_v55, %v1453_v46  ;;  %v4093_v55 = vand.u32 4294901760, %v4092_v54 }
 0x1d3   :  { %10321 = vmatprep.mubr.msk.f32.mxu0 %vm11007_vm1, %v11006_v50  ;;  %10329 = vmatprep.subr.mxu0 %v11006_v50 }
 0x1d4   :  { %10346 = vmatprep.mubr.msk.f32.mxu1 %vm11007_vm1, %v11006_v50  ;;  %10354 = vmatprep.subr.mxu1 %v11006_v50 }
 0x1d5   :  { %10322 = vmatmul.mubr.f32.vlgmr.msra.gmra.mxu0 %v2740_v22  ;;  %10347 = vmatmul.mubr.f32.vlgmr.msra.gmra.mxu1 %v11413_v32  ;;  %v11563_v22 = vsub.f32 %v4921_v13, %v11550_v17 }
 0x1d6   :  { %10330 = vmatpush3.xpose.msra.mxu0 %v2782_v12  ;;  %10355 = vmatpush3.xpose.msra.mxu1 %v11393_v20  ;;  %v4582_v12 = vand.u32 4294901760, %v11518_v10 }
 0x1d7   :  { %10331 = vmatprep.mubr.msk.f32.mxu0 %vm11007_vm1, %v11006_v50  ;;  %10339 = vmatprep.subr.mxu0 %v11006_v50  ;;  %v5032_v28 = vand.u32 4294901760, %v11563_v22 }
 0x1d8   :  { %10356 = vmatprep.mubr.msk.f32.mxu1 %vm11007_vm1, %v11006_v50  ;;  %10364 = vmatprep.subr.mxu1 %v11006_v50 }
 0x1d9   :  { %10332 = vmatmul.mubr.f32.vlgmr.msra.gmra.mxu0 %v11386_v16  ;;  %10357 = vmatmul.mubr.f32.vlgmr.msra.gmra.mxu1 %v3191_v40  ;;  %v4583_v16 = vsub.f32 %v11518_v10, %v4582_v12 }
 0x1da   :  { %10340 = vmatpush3.xpose.msra.mxu0 %v11393_v20  ;;  %10365 = vmatpush3.xpose.msra.mxu1 %v11393_v20  ;;  %v1628_v20 = vadd.f32 %v1627_v18, %v1537_v15 }
 0x1db   :  { %10341 = vmatprep.mubr.msk.f32.mxu0 %vm11007_vm1, %v11006_v50  ;;  %10349 = vmatprep.subr.mxu0 %v11006_v50  ;;  %v4584_v21 = vand.u32 4294901760, %v4583_v16 }
 0x1dc   :  { %10366 = vmatprep.mubr.msk.f32.mxu1 %vm11007_vm1, %v11006_v50  ;;  %10374 = vmatprep.subr.mxu1 %v11006_v50  ;;  %v11573_v26 = vadd.f32 %v1708_v24, %v1628_v20 }
 0x1dd   :  { %10342 = vmatmul.mubr.f32.vlgmr.msra.gmra.mxu0 %v3193_v51  ;;  %10367 = vmatmul.mubr.f32.vlgmr.msra.gmra.mxu1 %v11413_v32 }
 0x1de   :  { %10350 = vmatpush3.xpose.msra.mxu0 %v11400_v25  ;;  %10375 = vmatpush3.xpose.msra.mxu1 %v3684_v56  ;;  %v4541_v25 = vand.u32 4294901760, %v4540_v19  ;;  %v11591_v31 = vand.u32 4294901760, %v11573_v26 }
 0x1df   :  { %10351 = vmatprep.mubr.msk.f32.mxu0 %vm11007_vm1, %v11006_v50  ;;  %10359 = vmatprep.subr.mxu0 %v11006_v50 }
 0x1e0   :  { %10376 = vmatprep.mubr.msk.f32.mxu1 %vm11007_vm1, %v11006_v50  ;;  %10384 = vmatprep.subr.mxu1 %v11006_v50  ;;  %v11608_v35 = vsub.f32 %v11573_v26, %v11591_v31 }
 0x1e1   :  { %10352 = vmatmul.mubr.f32.vlgmr.msra.gmra.mxu0 %v3190_v36  ;;  %10377 = vmatmul.mubr.f32.vlgmr.msra.gmra.mxu1 %v11455_v47 }
 0x1e2   :  { %10360 = vmatpush3.xpose.msra.mxu0 %v3232_v29  ;;  %10385 = vmatpush3.xpose.msra.mxu1 %v11418_v33  ;;  %v4542_v29 = vsub.f32 %v4540_v19, %v4541_v25  ;;  %v5577_v38 = vand.u32 4294901760, %v11608_v35 }
 0x1e3   :  { %10361 = vmatprep.mubr.msk.f32.mxu0 %vm11007_vm1, %v11006_v50  ;;  %10369 = vmatprep.subr.mxu0 %v11006_v50 }
 0x1e4   :  { %10386 = vmatprep.mubr.msk.f32.mxu1 %vm11007_vm1, %v11006_v50  ;;  %10394 = vmatprep.subr.mxu1 %v11006_v50  ;;  %v5578_v40 = vsub.f32 %v11608_v35, %v5577_v38 }
 0x1e5   :  { %10362 = vmatmul.mubr.f32.vlgmr.msra.gmra.mxu0 %v11413_v32  ;;  %10387 = vmatmul.mubr.f32.vlgmr.msra.gmra.mxu1 %v3641_v59  ;;  %v5033_v32 = vsub.f32 %v11563_v22, %v5032_v28 }
 0x1e6   :  { %10370 = vmatpush3.xpose.msra.mxu0 %v11418_v33  ;;  %10395 = vmatpush3.xpose.msra.mxu1 %v11418_v33  ;;  %v4543_v33 = vand.u32 4294901760, %v4542_v29  ;;  %v5579_v44 = vand.u32 4294901760, %v5578_v40 }
 0x1e7   :  { %10371 = vmatprep.mubr.msk.f32.mxu0 %vm11007_vm1, %v11006_v50  ;;  %10379 = vmatprep.subr.mxu0 %v11006_v50  ;;  %v5034_v36 = vand.u32 4294901760, %v5033_v32 }
 0x1e8   :  { %10396 = vmatprep.mubr.msk.f32.mxu1 %vm11007_vm1, %v11006_v50  ;;  %10404 = vmatprep.subr.mxu1 %v11006_v50 }
 0x1e9   :  { %10372 = vmatmul.mubr.f32.vlgmr.msra.gmra.mxu0 %v3643_v6  ;;  %10397 = vmatmul.mubr.f32.vlgmr.msra.gmra.mxu1 %v11455_v47 }
 0x1ea   :  { %10380 = vmatpush3.xpose.msra.mxu0 %v11431_v37  ;;  %10405 = vmatpush3.xpose.msra.mxu1 %v4134_v8  ;;  %v4991_v37 = vand.u32 4294901760, %v4990_v34 }
 0x1eb   :  { %10381 = vmatprep.mubr.msk.f32.mxu0 %vm11007_vm1, %v11006_v50  ;;  %10389 = vmatprep.subr.mxu0 %v11006_v50 }
 0x1ec   :  { %10406 = vmatprep.mubr.msk.f32.mxu1 %vm11007_vm1, %v11006_v50  ;;  %10414 = vmatprep.subr.mxu1 %v11006_v50  ;;  %v4992_v39 = vsub.f32 %v4990_v34, %v4991_v37 }
 0x1ed   :  { %10382 = vmatmul.mubr.f32.vlgmr.msra.gmra.mxu0 %v3640_v52  ;;  %10407 = vmatmul.mubr.f32.vlgmr.msra.gmra.mxu1 %v11493_v0 }
 0x1ee   :  { %10390 = vmatpush3.xpose.msra.mxu0 %v3682_v42  ;;  %10415 = vmatpush3.xpose.msra.mxu1 %v11457_v48  ;;  %v4993_v43 = vand.u32 4294901760, %v4992_v39 }
 0x1ef   :  { %10391 = vmatprep.mubr.msk.f32.mxu0 %vm11007_vm1, %v11006_v50  ;;  %10399 = vmatprep.subr.mxu0 %v11006_v50 }
 0x1f0   :  { %10416 = vmatprep.mubr.msk.f32.mxu1 %vm11007_vm1, %v11006_v50  ;;  %10424 = vmatprep.subr.mxu1 %v11006_v50 }
 0x1f1   :  { %10392 = vmatmul.mubr.f32.vlgmr.msra.gmra.mxu0 %v11455_v47  ;;  %10417 = vmatmul.mubr.f32.vlgmr.msra.gmra.mxu1 %v4091_v9 }
 0x1f2   :  { %10400 = vmatpush3.xpose.msra.mxu0 %v11457_v48  ;;  %10425 = vmatpush3.xpose.msra.mxu1 %v11457_v48 }
 0x1f3   :  { %10401 = vmatprep.mubr.msk.f32.mxu0 %vm11007_vm1, %v11006_v50  ;;  %10409 = vmatprep.subr.mxu0 %v11006_v50 }
 0x1f4   :  { %10426 = vmatprep.mubr.msk.f32.mxu1 %vm11007_vm1, %v11006_v50  ;;  %10434 = vmatprep.subr.mxu1 %v11006_v50 }
 0x1f5   :  { %10402 = vmatmul.mubr.f32.vlgmr.msra.gmra.mxu0 %v4093_v55  ;;  %10427 = vmatmul.mubr.f32.vlgmr.msra.gmra.mxu1 %v11493_v0 }
 0x1f6   :  { %10410 = vmatpush3.xpose.msra.mxu0 %v11473_v53  ;;  %10435 = vmatpush3.xpose.msra.mxu1 %v4584_v21 }
 0x1f7   :  { %10411 = vmatprep.mubr.msk.f32.mxu0 %vm11007_vm1, %v11006_v50  ;;  %10419 = vmatprep.subr.mxu0 %v11006_v50 }
 0x1f8   :  { %10436 = vmatprep.mubr.msk.f32.mxu1 %vm11007_vm1, %v11006_v50  ;;  %10444 = vmatprep.subr.mxu1 %v11006_v50 }
 0x1f9   :  { %10412 = vmatmul.mubr.f32.vlgmr.msra.gmra.mxu0 %v11510_v4  ;;  %10437 = vmatmul.mubr.f32.vlgmr.msra.gmra.mxu1 %v11541_v14 }
 0x1fa   :  { %10420 = vmatpush3.xpose.msra.mxu0 %v4132_v62  ;;  %10445 = vmatpush3.xpose.msra.mxu1 %v11501_v3 }
 0x1fb   :  { %10421 = vmatprep.mubr.msk.f32.mxu0 %vm11007_vm1, %v11006_v50  ;;  %10429 = vmatprep.subr.mxu0 %v11006_v50 }
 0x1fc   :  { %10446 = vmatprep.mubr.msk.f32.mxu1 %vm11007_vm1, %v11006_v50  ;;  %10454 = vmatprep.subr.mxu1 %v11006_v50 }
 0x1fd   :  { %10422 = vmatmul.mubr.f32.vlgmr.msra.gmra.mxu0 %v11493_v0  ;;  %10447 = vmatmul.mubr.f32.vlgmr.msra.gmra.mxu1 %v4541_v25 }
 0x1fe   :  { %10430 = vmatpush3.xpose.msra.mxu0 %v11501_v3  ;;  %10455 = vmatpush3.xpose.msra.mxu1 %v11501_v3 }
 0x1ff   :  { %10431 = vmatprep.mubr.msk.f32.mxu0 %vm11007_vm1, %v11006_v50  ;;  %10439 = vmatprep.subr.mxu0 %v11006_v50 }
 0x200   :  { %10456 = vmatprep.mubr.msk.f32.mxu1 %vm11007_vm1, %v11006_v50  ;;  %10464 = vmatprep.subr.mxu1 %v11006_v50 }
 0x201   :  { %10432 = vmatmul.mubr.f32.vlgmr.msra.gmra.mxu0 %v4543_v33  ;;  %10457 = vmatmul.mubr.f32.vlgmr.msra.gmra.mxu1 %v11541_v14 }
 0x202   :  { %10440 = vmatpush3.xpose.msra.mxu0 %v11518_v10  ;;  %10465 = vmatpush3.xpose.msra.mxu1 %v5034_v36 }
 0x203   :  { %10441 = vmatprep.mubr.msk.f32.mxu0 %vm11007_vm1, %v11006_v50  ;;  %10449 = vmatprep.subr.mxu0 %v11006_v50 }
 0x204   :  { %10466 = vmatprep.mubr.msk.f32.mxu1 %vm11007_vm1, %v11006_v50  ;;  %10474 = vmatprep.subr.mxu1 %v11006_v50 }
 0x205   :  { %10442 = vmatmul.mubr.f32.vlgmr.msra.gmra.mxu0 %v4540_v19  ;;  %10467 = vmatmul.mubr.f32.vlgmr.msra.gmra.mxu1 %v11585_v30 }
 0x206   :  { %10450 = vmatpush3.xpose.msra.mxu0 %v4582_v12  ;;  %10475 = vmatpush3.xpose.msra.mxu1 %v11550_v17 }
 0x207   :  { %10451 = vmatprep.mubr.msk.f32.mxu0 %vm11007_vm1, %v11006_v50  ;;  %10459 = vmatprep.subr.mxu0 %v11006_v50 }
 0x208   :  { %10476 = vmatprep.mubr.msk.f32.mxu1 %vm11007_vm1, %v11006_v50  ;;  %10484 = vmatprep.subr.mxu1 %v11006_v50 }
 0x209   :  { %10452 = vmatmul.mubr.f32.vlgmr.msra.gmra.mxu0 %v11541_v14  ;;  %10477 = vmatmul.mubr.f32.vlgmr.msra.gmra.mxu1 %v4991_v37 }
 0x20a   :  { %10460 = vmatpush3.xpose.msra.mxu0 %v11550_v17  ;;  %10485 = vmatpush3.xpose.msra.mxu1 %v11550_v17  ;;  %v1921_v42 = vpop.f32.mrf.mxu1 }
 0x20b   :  { %10461 = vmatprep.mubr.msk.f32.mxu0 %vm11007_vm1, %v11006_v50  ;;  %10469 = vmatprep.subr.mxu0 %v11006_v50 }
 0x20c   :  { %v10258_v45 = vpop.f32.mrf.mxu1  ;;  %10486 = vmatprep.mubr.msk.f32.mxu1 %vm11007_vm1, %v11006_v50  ;;  %10494 = vmatprep.subr.mxu1 %v11006_v50 }
 0x20d   :  { %10462 = vmatmul.mubr.f32.vlgmr.msra.gmra.mxu0 %v4993_v43  ;;  %10487 = vmatmul.mubr.f32.vlgmr.msra.gmra.mxu1 %v11585_v30 }
 0x20e   :  { %10470 = vmatpush3.xpose.msra.mxu0 %v11563_v22  ;;  %v2069_v47 = vpop.f32.mrf.mxu1  ;;  %10471 = vmatprep.mubr.msk.f32.mxu0 %vm11007_vm1, %v11006_v50 }
 0x20f   :  { %10479 = vmatprep.subr.mxu0 %v11006_v50  ;;  %10495 = vmatpush3.msra.mxu1 %v5579_v44 }
 0x210   :  { %v10268_v48 = vpop.f32.mrf.mxu1  ;;  %10496 = vmatprep.mubr.msk.f32.mxu1 %vm11007_vm1, %v11006_v50  ;;  %10504 = vmatprep.subr.mxu1 %v11006_v50 }
 0x211   :  { %10472 = vmatmul.mubr.f32.vlgmr.msra.gmra.mxu0 %v4990_v34 }
 0x212   :  { %10480 = vmatpush3.xpose.msra.mxu0 %v5032_v28  ;;  %v1845_v41 = vpop.f32.mrf.mxu0  ;;  %v2215_v51 = vpop.f32.mrf.mxu1  ;;  %10481 = vmatprep.mubr.msk.f32.mxu0 %vm11007_vm1, %v11006_v50 }
 0x213   :  { %10489 = vmatprep.subr.mxu0 %v11006_v50  ;;  %v1922_v56 = vadd.f32 %v1921_v42, %v1845_v41 }
 0x214   :  { %v10253_v52 = vpop.f32.mrf.mxu0  ;;  %v10278_v53 = vpop.f32.mrf.mxu1 }
 0x215   :  { %10482 = vmatmul.mubr.f32.vlgmr.msra.gmra.mxu0 %v11585_v30 }
 0x216   :  { %v1995_v57 = vpop.f32.mrf.mxu0  ;;  %10490 = vmatpush3.msra.mxu0 %v11591_v31  ;;  %10491 = vmatprep.mubr.msk.f32.mxu0 %vm11007_vm1, %v11006_v50 }
 0x217   :  { %v1996_v58 = vadd.f32 %v1995_v57, %v1922_v56  ;;  %10499 = vmatprep.subr.mxu0 %v11006_v50 }
 0x218   :  { %v10263_v59 = vpop.f32.mrf.mxu0 }
 0x219   :  { %v2070_v61 = vadd.f32 %v2069_v47, %v1996_v58 }
 0x21a   :  { %v2143_v62 = vpop.f32.mrf.mxu0 }
 0x21b   :  { %v2144_v63 = vadd.f32 %v2143_v62, %v2070_v61 }
 0x21c   :  { %v10273_v0 = vpop.f32.mrf.mxu0 }
 0x21d   :  { %v11662_v1 = vadd.f32 %v2215_v51, %v2144_v63 }
 0x21f   :  { %v5369_v2 = vsel %vm1768_vm2, %v11662_v1, -inf }
 0x220   :  { %5370 = vmax.xlane.f32.xlu0 %v5369_v2 }
 0x27d   :  { %v2371_v3 = vpop.f32.mrf.mxu1 }
 0x27f   :  { %v10288_v4 = vpop.f32.mrf.mxu1 }
 0x281   :  { %v2519_v6 = vpop.f32.mrf.mxu1 }
 0x283   :  { %v10298_v7 = vpop.f32.mrf.mxu1 }
 0x285   :  { %v2295_v8 = vpop.f32.mrf.mxu0  ;;  %v2665_v10 = vpop.f32.mrf.mxu1 }
 0x286   :  { %v2372_v9 = vadd.f32 %v2371_v3, %v2295_v8 }
 0x287   :  { %v10283_v5 = vpop.f32.mrf.mxu0  ;;  %v10308_v11 = vpop.f32.mrf.mxu1 }
 0x289   :  { %v2445_v46 = vpop.f32.mrf.mxu0  ;;  %v2821_v49 = vpop.f32.mrf.mxu1 }
 0x28a   :  { %v2446_v12 = vadd.f32 %v2445_v46, %v2372_v9 }
 0x28b   :  { %v10293_v13 = vpop.f32.mrf.mxu0  ;;  %v10318_v54 = vpop.f32.mrf.mxu1 }
 0x28c   :  { %v2520_v14 = vadd.f32 %v2519_v6, %v2446_v12 }
 0x28d   :  { %v2593_v15 = vpop.f32.mrf.mxu0  ;;  %v2969_v16 = vpop.f32.mrf.mxu1 }
 0x28e   :  { %v2594_v17 = vadd.f32 %v2593_v15, %v2520_v14 }
 0x28f   :  { %v10303_v18 = vpop.f32.mrf.mxu0  ;;  %v10328_v55 = vpop.f32.mrf.mxu1 }
 0x290   :  { %v11666_v19 = vadd.f32 %v2665_v10, %v2594_v17 }
 0x291   :  { %v2745_v20 = vpop.f32.mrf.mxu0  ;;  %v3115_v21 = vpop.f32.mrf.mxu1 }
 0x292   :  { %v5372_v22 = vsel %vm1768_vm2, %v11666_v19, -inf  ;;  %v2822_v25 = vadd.f32 %v2821_v49, %v2745_v20 }
 0x293   :  { %v10338_v23 = vpop.f32.mrf.mxu1  ;;  %5373 = vmax.xlane.f32.xlu1 %v5372_v22  ;;  %v10313_v24 = vpop.f32.mrf.mxu0 }
 0x295   :  { %v2895_v27 = vpop.f32.mrf.mxu0  ;;  %v3271_v28 = vpop.f32.mrf.mxu1 }
 0x296   :  { %v2896_v29 = vadd.f32 %v2895_v27, %v2822_v25 }
 0x297   :  { %v10323_v30 = vpop.f32.mrf.mxu0  ;;  %v10348_v32 = vpop.f32.mrf.mxu1 }
 0x298   :  { %v2970_v33 = vadd.f32 %v2969_v16, %v2896_v29 }
 0x299   :  { %v3043_v34 = vpop.f32.mrf.mxu0  ;;  %v3419_v36 = vpop.f32.mrf.mxu1 }
 0x29a   :  { %v3044_v37 = vadd.f32 %v3043_v34, %v2970_v33 }
 0x29b   :  { %v10333_v39 = vpop.f32.mrf.mxu0  ;;  %v10358_v40 = vpop.f32.mrf.mxu1 }
 0x29c   :  { %v11670_v42 = vadd.f32 %v3115_v21, %v3044_v37 }
 0x29d   :  { %v3195_v43 = vpop.f32.mrf.mxu0  ;;  %v3565_v44 = vpop.f32.mrf.mxu1 }
 0x29e   :  { %v5375_v45 = vsel %vm1768_vm2, %v11670_v42, -inf  ;;  %v3272_v41 = vadd.f32 %v3271_v28, %v3195_v43 }
 0x29f   :  { %v10368_v47 = vpop.f32.mrf.mxu1  ;;  %5376 = vmax.xlane.f32.xlu0 %v5375_v45  ;;  %v10343_v48 = vpop.f32.mrf.mxu0 }
 0x2a1   :  { %v3345_v51 = vpop.f32.mrf.mxu0  ;;  %v3721_v52 = vpop.f32.mrf.mxu1 }
 0x2a2   :  { %v3346_v53 = vadd.f32 %v3345_v51, %v3272_v41 }
 0x2a3   :  { %v10353_v56 = vpop.f32.mrf.mxu0  ;;  %v10378_v57 = vpop.f32.mrf.mxu1 }
 0x2a4   :  { %v3420_v58 = vadd.f32 %v3419_v36, %v3346_v53 }
 0x2a5   :  { %v3493_v59 = vpop.f32.mrf.mxu0  ;;  %v3869_v61 = vpop.f32.mrf.mxu1 }
 0x2a6   :  { %v3494_v62 = vadd.f32 %v3493_v59, %v3420_v58 }
 0x2a7   :  { %v10363_v63 = vpop.f32.mrf.mxu0  ;;  %v10388_v0 = vpop.f32.mrf.mxu1 }
 0x2a8   :  { %v11674_v2 = vadd.f32 %v3565_v44, %v3494_v62 }
 0x2a9   :  { %v4015_v3 = vpop.f32.mrf.mxu1  ;;  %v5371_v4 = vpop.xlane.xlu0 %5370 }
 0x2aa   :  { %v5393_v6 = vsub.f32 %v11662_v1, %v5371_v4  ;;  %v3645_v7 = vpop.f32.mrf.mxu0  ;;  %v5378_v8 = vsel %vm1768_vm2, %v11674_v2, -inf }
 0x2ab   :  { %v10398_v10 = vpop.f32.mrf.mxu1  ;;  %5379 = vmax.xlane.f32.xlu0 %v5378_v8  ;;  %v3722_v9 = vadd.f32 %v3721_v52, %v3645_v7 }
 0x2ac   :  { %v5401_v5 = vmul.f32 1.442695, %v5393_v6  ;;  %v10373_v11 = vpop.f32.mrf.mxu0 }
 0x2ad   :  { %v4171_v46 = vpop.f32.mrf.mxu1 }
 0x2ae   :  { %10811 = vpow2.f32 %v5401_v5  ;;  %v3795_v49 = vpop.f32.mrf.mxu0 }
 0x2af   :  { %v3796_v12 = vadd.f32 %v3795_v49, %v3722_v9  ;;  %v10408_v13 = vpop.f32.mrf.mxu1 }
 0x2b0   :  { %v10383_v54 = vpop.f32.mrf.mxu0 }
 0x2b1   :  { %v3870_v14 = vadd.f32 %v3869_v61, %v3796_v12  ;;  %v4319_v15 = vpop.f32.mrf.mxu1 }
 0x2b2   :  { %v3943_v16 = vpop.f32.mrf.mxu0 }
 0x2b3   :  { %v3944_v17 = vadd.f32 %v3943_v16, %v3870_v14  ;;  %v10418_v1 = vpop.f32.mrf.mxu1 }
 0x2b4   :  { %v10393_v18 = vpop.f32.mrf.mxu0 }
 0x2b5   :  { %v4465_v55 = vpop.f32.mrf.mxu1  ;;  %v11679_v20 = vadd.f32 %v4015_v3, %v3944_v17 }
 0x2b6   :  { %v4095_v21 = vpop.f32.mrf.mxu0 }
 0x2b7   :  { %v10428_v22 = vpop.f32.mrf.mxu1  ;;  %v5381_v23 = vsel %vm1768_vm2, %v11679_v20, -inf  ;;  %v4172_v25 = vadd.f32 %v4171_v46, %v4095_v21 }
 0x2b8   :  { %5382 = vmax.xlane.f32.xlu1 %v5381_v23  ;;  %v10403_v24 = vpop.f32.mrf.mxu0 }
 0x2b9   :  { %v4621_v27 = vpop.f32.mrf.mxu1 }
 0x2ba   :  { %v4245_v28 = vpop.f32.mrf.mxu0 }
 0x2bb   :  { %v11683_v29 = vpop.eup %10811  ;;  %v4246_v30 = vadd.f32 %v4245_v28, %v4172_v25  ;;  %v10438_v32 = vpop.f32.mrf.mxu1 }
 0x2bc   :  { %v10413_v33 = vpop.f32.mrf.mxu0  ;;  %v5417_v34 = vsel %vm1768_vm2, %v11683_v29, 0.0 }
 0x2bd   :  { %v4769_v36 = vpop.f32.mrf.mxu1  ;;  %5418 = vadd.xlane.f32.xlu1 %v5417_v34  ;;  %v4320_v37 = vadd.f32 %v4319_v15, %v4246_v30 }
 0x2be   :  { %v4393_v39 = vpop.f32.mrf.mxu0 }
 0x2bf   :  { %v4394_v40 = vadd.f32 %v4393_v39, %v4320_v37  ;;  %v10448_v43 = vpop.f32.mrf.mxu1 }
 0x2c0   :  { %v10423_v44 = vpop.f32.mrf.mxu0 }
 0x2c1   :  { %v4915_v45 = vpop.f32.mrf.mxu1  ;;  %v11687_v47 = vadd.f32 %v4465_v55, %v4394_v40 }
 0x2c2   :  { %v4545_v48 = vpop.f32.mrf.mxu0 }
 0x2c3   :  { %v10458_v41 = vpop.f32.mrf.mxu1  ;;  %v5384_v51 = vsel %vm1768_vm2, %v11687_v47, -inf  ;;  %v4622_v53 = vadd.f32 %v4621_v27, %v4545_v48 }
 0x2c4   :  { %5385 = vmax.xlane.f32.xlu0 %v5384_v51  ;;  %v10433_v52 = vpop.f32.mrf.mxu0 }
 0x2c5   :  { %v5071_v56 = vpop.f32.mrf.mxu1 }
 0x2c6   :  { %v4695_v57 = vpop.f32.mrf.mxu0 }
 0x2c7   :  { %v4696_v58 = vadd.f32 %v4695_v57, %v4622_v53  ;;  %v10468_v59 = vpop.f32.mrf.mxu1 }
 0x2c8   :  { %v10443_v61 = vpop.f32.mrf.mxu0 }
 0x2c9   :  { %v4770_v62 = vadd.f32 %v4769_v36, %v4696_v58  ;;  %v5219_v63 = vpop.f32.mrf.mxu1 }
 0x2ca   :  { %v4843_v0 = vpop.f32.mrf.mxu0 }
 0x2cb   :  { %v4844_v3 = vadd.f32 %v4843_v0, %v4770_v62  ;;  %v10478_v4 = vpop.f32.mrf.mxu1 }
 0x2cc   :  { %v10453_v6 = vpop.f32.mrf.mxu0 }
 0x2cd   :  { %v5365_v7 = vpop.f32.mrf.mxu1  ;;  %v11691_v8 = vadd.f32 %v4915_v45, %v4844_v3 }
 0x2ce   :  { %v4995_v10 = vpop.f32.mrf.mxu0 }
 0x2cf   :  { %v10488_v5 = vpop.f32.mrf.mxu1  ;;  %v5387_v11 = vsel %vm1768_vm2, %v11691_v8, -inf  ;;  %v5072_v46 = vadd.f32 %v5071_v56, %v4995_v10 }
 0x2d0   :  { %5388 = vmax.xlane.f32.xlu1 %v5387_v11  ;;  %v10463_v9 = vpop.f32.mrf.mxu0 }
 0x2d2   :  { %v5145_v49 = vpop.f32.mrf.mxu0 }
 0x2d3   :  { %v5146_v12 = vadd.f32 %v5145_v49, %v5072_v46 }
 0x2d4   :  { %v10473_v13 = vpop.f32.mrf.mxu0 }
 0x2d5   :  { %v5220_v54 = vadd.f32 %v5219_v63, %v5146_v12 }
 0x2d6   :  { %v5293_v14 = vpop.f32.mrf.mxu0 }
 0x2d7   :  { %v5294_v15 = vadd.f32 %v5293_v14, %v5220_v54 }
 0x2d8   :  { %v10483_v16 = vpop.f32.mrf.mxu0 }
 0x2d9   :  { %v11695_v17 = vadd.f32 %v5365_v7, %v5294_v15 }
 0x2db   :  { %v5390_v1 = vsel %vm1768_vm2, %v11695_v17, -inf }
 0x2dc   :  { %5391 = vmax.xlane.f32.xlu0 %v5390_v1 }
 0x2e1   :  { %1750 = vrot.lane.b32.xlu1 %v11573_v26, %s11009_s4 }
 0x2f2   :  { %1756 = vrot.lane.b32.xlu0 %v11573_v26, %s11008_s2 }
 0x31c   :  { %v5374_v18 = vpop.xlane.xlu1 %5373 }
 0x31d   :  { %v5394_v55 = vsub.f32 %v11666_v19, %v5374_v18 }
 0x31f   :  { %v5403_v21 = vmul.f32 1.442695, %v5394_v55 }
 0x321   :  { %10813 = vpow2.f32 %v5403_v21 }
 0x328   :  { %v5377_v22 = vpop.xlane.xlu0 %5376 }
 0x329   :  { %v5395_v23 = vsub.f32 %v11670_v42, %v5377_v22 }
 0x32b   :  { %v5405_v24 = vmul.f32 1.442695, %v5395_v23 }
 0x32d   :  { %10815 = vpow2.f32 %v5405_v24 }
 0x32e   :  { %v11705_v25 = vpop.eup %10813 }
 0x32f   :  { %v5420_v27 = vsel %vm1768_vm2, %v11705_v25, 0.0 }
 0x330   :  { %5421 = vadd.xlane.f32.xlu0 %v5420_v27 }
 0x334   :  { %v5380_v28 = vpop.xlane.xlu0 %5379 }
 0x335   :  { %v5396_v30 = vsub.f32 %v11674_v2, %v5380_v28 }
 0x337   :  { %v5407_v32 = vmul.f32 1.442695, %v5396_v30 }
 0x339   :  { %10817 = vpow2.f32 %v5407_v32 }
 0x33a   :  { %v11710_v33 = vpop.eup %10815 }
 0x33b   :  { %v5423_v19 = vsel %vm1768_vm2, %v11710_v33, 0.0 }
 0x33c   :  { %5424 = vadd.xlane.f32.xlu1 %v5423_v19 }
 0x341   :  { %v5383_v42 = vpop.xlane.xlu1 %5382 }
 0x342   :  { %v5397_v34 = vsub.f32 %v11679_v20, %v5383_v42 }
 0x344   :  { %v5409_v36 = vmul.f32 1.442695, %v5397_v34 }
 0x346   :  { %v11715_v37 = vpop.eup %10817  ;;  %10819 = vpow2.f32 %v5409_v36  ;;  %v5419_v39 = vpop.xlane.xlu1 %5418 }
 0x347   :  { %10821 = vrcp.f32 %v5419_v39  ;;  %v5426_v2 = vsel %vm1768_vm2, %v11715_v37, 0.0 }
 0x348   :  { %5427 = vadd.xlane.f32.xlu0 %v5426_v2 }
 0x34d   :  { %v5386_v40 = vpop.xlane.xlu0 %5385 }
 0x34e   :  { %v5398_v43 = vsub.f32 %v11687_v47, %v5386_v40 }
 0x350   :  { %v5411_v44 = vmul.f32 1.442695, %v5398_v43 }
 0x352   :  { %10823 = vpow2.f32 %v5411_v44 }
 0x353   :  { %v11720_v45 = vpop.eup %10819 }
 0x354   :  { %v10822_v48 = vpop.eup %10821  ;;  %v5429_v20 = vsel %vm1768_vm2, %v11720_v45, 0.0 }
 0x355   :  { %5430 = vadd.xlane.f32.xlu0 %v5429_v20  ;;  %v5442_v41 = vmul.f32 %v10822_v48, %v11683_v29  ;;  %v11833_v48 = vand.u32 4294901760, %v11373_v60 }
 0x357   :  { %5457 = vst.msk [vmem:[#allocation12] sm:$0xff] %vm1768_vm2, %v5442_v41  ;;  %v5466_v51 = vsel %vm1768_vm2, %v5442_v41, 0 }
 0x358   :  { %v5534_v52 = vand.u32 4294901760, %v5466_v51 }
 0x359   :  { %v5389_v53 = vpop.xlane.xlu1 %5388 }
 0x35a   :  { %v5535_v56 = vsub.f32 %v5466_v51, %v5534_v52  ;;  %10497 = vmatmul.mubr.f32.vlgmr.msra.gmra.mxu1 %v5534_v52 }
 0x35b   :  { %10505 = vmatpush3.msra.mxu1 %v11591_v31  ;;  %10506 = vmatprep.mubr.msk.f32.mxu1 %vm11007_vm1, %v11006_v50 }
 0x35c   :  { %10514 = vmatprep.subr.mxu1 %v11006_v50  ;;  %v5536_v47 = vand.u32 4294901760, %v5535_v56 }
 0x35d   :  { %v1751_v57 = vpop.permute.xlu1 %1750 }
 0x35e   :  { %v11731_v58 = vand.u32 4294901760, %v1751_v57  ;;  %10507 = vmatmul.mubr.f32.vlgmr.msra.gmra.mxu1 %v5536_v47  ;;  %v5537_v29 = vsub.f32 %v5535_v56, %v5536_v47 }
 0x35f   :  { %v11733_v59 = vpop.eup %10823  ;;  %10515 = vmatpush3.msra.mxu1 %v11591_v31  ;;  %10516 = vmatprep.mubr.msk.f32.mxu1 %vm11007_vm1, %v11006_v50 }
 0x360   :  { %v11739_v61 = vsub.f32 %v1751_v57, %v11731_v58  ;;  %v5432_v62 = vsel %vm1768_vm2, %v11733_v59, 0.0  ;;  %v5538_v63 = vand.u32 4294901760, %v5537_v29  ;;  %10524 = vmatprep.subr.mxu1 %v11006_v50 }
 0x361   :  { %5433 = vadd.xlane.f32.xlu1 %v5432_v62 }
 0x362   :  { %v6026_v0 = vand.u32 4294901760, %v11739_v61  ;;  %10492 = vmatmul.mubr.f32.vlgmr.msra.gmra.mxu0 %v5538_v63  ;;  %10517 = vmatmul.mubr.f32.vlgmr.msra.gmra.mxu1 %v5534_v52 }
 0x363   :  { %10500 = vmatpush3.msra.mxu0 %v11608_v35  ;;  %10501 = vmatprep.mubr.msk.f32.mxu0 %vm11007_vm1, %v11006_v50  ;;  %v5399_v35 = vsub.f32 %v11691_v8, %v5389_v53  ;;  %v11842_v53 = vsub.f32 %v11373_v60, %v11833_v48 }
 0x364   :  { %v6027_v31 = vsub.f32 %v11739_v61, %v6026_v0  ;;  %10509 = vmatprep.subr.mxu0 %v11006_v50  ;;  %10526 = vmatprep.mubr.msk.f32.mxu1 %vm11007_vm1, %v11006_v50 }
 0x365   :  { %v5392_v4 = vpop.xlane.xlu0 %5391 }
 0x366   :  { %v6028_v3 = vand.u32 4294901760, %v6027_v31  ;;  %10502 = vmatmul.mubr.f32.vlgmr.msra.gmra.mxu0 %v5535_v56  ;;  %v5400_v6 = vsub.f32 %v11695_v17, %v5392_v4 }
 0x367   :  { %10510 = vmatpush3.msra.mxu0 %v5577_v38  ;;  %10511 = vmatprep.mubr.msk.f32.mxu0 %vm11007_vm1, %v11006_v50  ;;  %v5413_v38 = vmul.f32 1.442695, %v5399_v35 }
 0x368   :  { %10525 = vmatpush3.msra.mxu1 %v6028_v3  ;;  %10519 = vmatprep.subr.mxu0 %v11006_v50  ;;  %v5415_v7 = vmul.f32 1.442695, %v5400_v6 }
 0x369   :  { %10534 = vmatprep.subr.mxu1 %v11006_v50  ;;  %10825 = vpow2.f32 %v5413_v38  ;;  %v1757_v11 = vpop.permute.xlu0 %1756 }
 0x36a   :  { %10512 = vmatmul.mubr.f32.vlgmr.msra.gmra.mxu0 %v5534_v52  ;;  %10827 = vpow2.f32 %v5415_v7  ;;  %v6397_v46 = vand.u32 4294901760, %v1757_v11 }
 0x36b   :  { %10520 = vmatpush3.msra.mxu0 %v11731_v58  ;;  %1762 = vrot.lane.b32.xlu0 %v11573_v26, %s11010_s25 }
 0x36c   :  { %10521 = vmatprep.mubr.msk.f32.mxu0 %vm11007_vm1, %v11006_v50  ;;  %10529 = vmatprep.subr.mxu0 %v11006_v50  ;;  %v11782_v13 = vsub.f32 %v1757_v11, %v6397_v46 }
 0x36e   :  { %v6475_v16 = vand.u32 4294901760, %v11782_v13 }
 0x370   :  { %v6476_v18 = vsub.f32 %v11782_v13, %v6475_v16 }
 0x372   :  { %1752 = vrot.lane.b32.xlu1 %v11373_v60, %s11009_s4  ;;  %v6477_v24 = vand.u32 4294901760, %v6476_v18 }
 0x376   :  { %v11770_v10 = vpop.eup %10825 }
 0x377   :  { %v5435_v26 = vsel %vm1768_vm2, %v11770_v10, 0.0  ;;  %v11774_v5 = vpop.eup %10827 }
 0x378   :  { %v5438_v8 = vsel %vm1768_vm2, %v11774_v5, 0.0 }
 0x38a   :  { %5436 = vadd.xlane.f32.xlu0 %v5435_v26 }
 0x396   :  { %5439 = vadd.xlane.f32.xlu1 %v5438_v8 }
 0x3a0   :  { %1758 = vrot.lane.b32.xlu0 %v11373_v60, %s11008_s2 }
 0x3a7   :  { %1764 = vrot.lane.b32.xlu1 %v11373_v60, %s11010_s25 }
 0x3b9   :  { %v5422_v9 = vpop.xlane.xlu0 %5421 }
 0x3ba   :  { %10829 = vrcp.f32 %v5422_v9 }
 0x3c5   :  { %v5425_v49 = vpop.xlane.xlu1 %5424 }
 0x3c6   :  { %10831 = vrcp.f32 %v5425_v49 }
 0x3c7   :  { %v10830_v12 = vpop.eup %10829 }
 0x3c8   :  { %v5444_v54 = vmul.f32 %v10830_v12, %v11705_v25 }
 0x3ca   :  { %5458 = vst.msk [vmem:[#allocation12 + $0x8] sm:$0xff] %vm1768_vm2, %v5444_v54  ;;  %v5915_v14 = vsel %vm1768_vm2, %v5444_v54, 0 }
 0x3cb   :  { %v5983_v15 = vand.u32 4294901760, %v5915_v14 }
 0x3cd   :  { %v5984_v17 = vsub.f32 %v5915_v14, %v5983_v15  ;;  %10527 = vmatmul.mubr.f32.vlgmr.msra.gmra.mxu1 %v5983_v15 }
 0x3ce   :  { %10535 = vmatpush3.msra.mxu1 %v11731_v58  ;;  %10536 = vmatprep.mubr.msk.f32.mxu1 %vm11007_vm1, %v11006_v50 }
 0x3cf   :  { %10544 = vmatprep.subr.mxu1 %v11006_v50  ;;  %v5985_v1 = vand.u32 4294901760, %v5984_v17 }
 0x3d1   :  { %10537 = vmatmul.mubr.f32.vlgmr.msra.gmra.mxu1 %v5985_v1  ;;  %v5428_v55 = vpop.xlane.xlu0 %5427  ;;  %v5986_v21 = vsub.f32 %v5984_v17, %v5985_v1 }
 0x3d2   :  { %10545 = vmatpush3.msra.mxu1 %v11731_v58  ;;  %10833 = vrcp.f32 %v5428_v55  ;;  %10546 = vmatprep.mubr.msk.f32.mxu1 %vm11007_vm1, %v11006_v50 }
 0x3d3   :  { %v10832_v22 = vpop.eup %10831  ;;  %10554 = vmatprep.subr.mxu1 %v11006_v50  ;;  %v5987_v23 = vand.u32 4294901760, %v5986_v21 }
 0x3d4   :  { %v5446_v25 = vmul.f32 %v10832_v22, %v11710_v33 }
 0x3d5   :  { %10522 = vmatmul.mubr.f32.vlgmr.msra.gmra.mxu0 %v5987_v23  ;;  %10547 = vmatmul.mubr.f32.vlgmr.msra.gmra.mxu1 %v5983_v15 }
 0x3d6   :  { %10530 = vmatpush3.msra.mxu0 %v11739_v61  ;;  %10555 = vmatpush3.msra.mxu1 %v6477_v24  ;;  %5459 = vst.msk [vmem:[#allocation12 + $0x10] sm:$0xff] %vm1768_vm2, %v5446_v25  ;;  %v6364_v27 = vsel %vm1768_vm2, %v5446_v25, 0  ;;  %v7373_v61 = vand.u32 4294901760, %v11842_v53 }
 0x3d7   :  { %10531 = vmatprep.mubr.msk.f32.mxu0 %vm11007_vm1, %v11006_v50  ;;  %10539 = vmatprep.subr.mxu0 %v11006_v50  ;;  %v6432_v28 = vand.u32 4294901760, %v6364_v27 }
 0x3d8   :  { %10556 = vmatprep.mubr.msk.f32.mxu1 %vm11007_vm1, %v11006_v50  ;;  %10564 = vmatprep.subr.mxu1 %v11006_v50 }
 0x3d9   :  { %10532 = vmatmul.mubr.f32.vlgmr.msra.gmra.mxu0 %v5984_v17  ;;  %v6433_v30 = vsub.f32 %v6364_v27, %v6432_v28  ;;  %10557 = vmatmul.mubr.f32.vlgmr.msra.gmra.mxu1 %v6432_v28 }
 0x3da   :  { %10540 = vmatpush3.msra.mxu0 %v6026_v0  ;;  %10565 = vmatpush3.msra.mxu1 %v6397_v46  ;;  %v7374_v0 = vsub.f32 %v11842_v53, %v7373_v61 }
 0x3db   :  { %10541 = vmatprep.mubr.msk.f32.mxu0 %vm11007_vm1, %v11006_v50  ;;  %10549 = vmatprep.subr.mxu0 %v11006_v50  ;;  %v6434_v32 = vand.u32 4294901760, %v6433_v30 }
 0x3dc   :  { %10566 = vmatprep.mubr.msk.f32.mxu1 %vm11007_vm1, %v11006_v50  ;;  %10574 = vmatprep.subr.mxu1 %v11006_v50  ;;  %v7375_v38 = vand.u32 4294901760, %v7374_v0 }
 0x3dd   :  { %10542 = vmatmul.mubr.f32.vlgmr.msra.gmra.mxu0 %v5983_v15  ;;  %10567 = vmatmul.mubr.f32.vlgmr.msra.gmra.mxu1 %v6434_v32  ;;  %v6435_v33 = vsub.f32 %v6433_v30, %v6434_v32 }
 0x3de   :  { %10550 = vmatpush3.msra.mxu0 %v6397_v46  ;;  %10575 = vmatpush3.msra.mxu1 %v6397_v46  ;;  %v5431_v19 = vpop.xlane.xlu0 %5430 }
 0x3df   :  { %v10834_v42 = vpop.eup %10833  ;;  %10835 = vrcp.f32 %v5431_v19  ;;  %10551 = vmatprep.mubr.msk.f32.mxu0 %vm11007_vm1, %v11006_v50  ;;  %10559 = vmatprep.subr.mxu0 %v11006_v50  ;;  %v6436_v34 = vand.u32 4294901760, %v6435_v33 }
 0x3e0   :  { %v5448_v36 = vmul.f32 %v10834_v42, %v11715_v37  ;;  %10576 = vmatprep.mubr.msk.f32.mxu1 %vm11007_vm1, %v11006_v50  ;;  %10584 = vmatprep.subr.mxu1 %v11006_v50 }
 0x3e1   :  { %10552 = vmatmul.mubr.f32.vlgmr.msra.gmra.mxu0 %v6436_v34  ;;  %10577 = vmatmul.mubr.f32.vlgmr.msra.gmra.mxu1 %v6432_v28 }
 0x3e2   :  { %5460 = vst.msk [vmem:[#allocation12 + $0x18] sm:$0xff] %vm1768_vm2, %v5448_v36  ;;  %10560 = vmatpush3.msra.mxu0 %v11782_v13  ;;  %v1763_v39 = vpop.permute.xlu0 %1762  ;;  %10561 = vmatprep.mubr.msk.f32.mxu0 %vm11007_vm1, %v11006_v50  ;;  %v6813_v2 = vsel %vm1768_vm2, %v5448_v36, 0 }
 0x3e3   :  { %v6846_v40 = vand.u32 4294901760, %v1763_v39  ;;  %10569 = vmatprep.subr.mxu0 %v11006_v50  ;;  %10586 = vmatprep.mubr.msk.f32.mxu1 %vm11007_vm1, %v11006_v50  ;;  %v6881_v37 = vand.u32 4294901760, %v6813_v2 }
 0x3e5   :  { %v6923_v43 = vsub.f32 %v1763_v39, %v6846_v40  ;;  %10562 = vmatmul.mubr.f32.vlgmr.msra.gmra.mxu0 %v6433_v30  ;;  %v6882_v44 = vsub.f32 %v6813_v2, %v6881_v37 }
 0x3e6   :  { %10570 = vmatpush3.msra.mxu0 %v6475_v16  ;;  %10571 = vmatprep.mubr.msk.f32.mxu0 %vm11007_vm1, %v11006_v50 }
 0x3e7   :  { %v6924_v20 = vand.u32 4294901760, %v6923_v43  ;;  %10579 = vmatprep.subr.mxu0 %v11006_v50  ;;  %v6883_v41 = vand.u32 4294901760, %v6882_v44 }
 0x3e9   :  { %v6925_v51 = vsub.f32 %v6923_v43, %v6924_v20  ;;  %10572 = vmatmul.mubr.f32.vlgmr.msra.gmra.mxu0 %v6432_v28  ;;  %v6884_v52 = vsub.f32 %v6882_v44, %v6883_v41 }
 0x3ea   :  { %v5434_v56 = vpop.xlane.xlu1 %5433  ;;  %10580 = vmatpush3.msra.mxu0 %v6846_v40  ;;  %10581 = vmatprep.mubr.msk.f32.mxu0 %vm11007_vm1, %v11006_v50 }
 0x3eb   :  { %v6926_v47 = vand.u32 4294901760, %v6925_v51  ;;  %10837 = vrcp.f32 %v5434_v56  ;;  %10589 = vmatprep.subr.mxu0 %v11006_v50  ;;  %v6885_v57 = vand.u32 4294901760, %v6884_v52 }
 0x3ec   :  { %v10836_v58 = vpop.eup %10835 }
 0x3ed   :  { %v5450_v29 = vmul.f32 %v10836_v58, %v11720_v45  ;;  %10585 = vmatpush3.msra.mxu1 %v6926_v47  ;;  %10582 = vmatmul.mubr.f32.vlgmr.msra.gmra.mxu0 %v6885_v57 }
 0x3ee   :  { %v1753_v62 = vpop.permute.xlu1 %1752  ;;  %10587 = vmatmul.mubr.f32.vlgmr.msra.gmra.mxu1 %v6881_v37  ;;  %10590 = vmatpush3.msra.mxu0 %v6923_v43 }
 0x3ef   :  { %5461 = vst.msk [vmem:[#allocation12 + $0x20] sm:$0xff] %vm1768_vm2, %v5450_v29  ;;  %10594 = vmatprep.subr.mxu1 %v11006_v50  ;;  %10591 = vmatprep.mubr.msk.f32.mxu0 %vm11007_vm1, %v11006_v50  ;;  %v7262_v60 = vsel %vm1768_vm2, %v5450_v29, 0  ;;  %v11856_v63 = vand.u32 4294901760, %v1753_v62 }
 0x3f0   :  { %10595 = vmatpush3.msra.mxu1 %v6846_v40  ;;  %10596 = vmatprep.mubr.msk.f32.mxu1 %vm11007_vm1, %v11006_v50  ;;  %v7330_v45 = vand.u32 4294901760, %v7262_v60 }
 0x3f1   :  { %10599 = vmatprep.subr.mxu0 %v11006_v50  ;;  %10604 = vmatprep.subr.mxu1 %v11006_v50  ;;  %v7821_v35 = vsub.f32 %v1753_v62, %v11856_v63 }
 0x3f2   :  { %10592 = vmatmul.mubr.f32.vlgmr.msra.gmra.mxu0 %v6882_v44  ;;  %10597 = vmatmul.mubr.f32.vlgmr.msra.gmra.mxu1 %v6883_v41  ;;  %v7331_v31 = vsub.f32 %v7262_v60, %v7330_v45 }
 0x3f3   :  { %10600 = vmatpush3.msra.mxu0 %v6924_v20  ;;  %10605 = vmatpush3.msra.mxu1 %v6846_v40  ;;  %v7822_v8 = vand.u32 4294901760, %v7821_v35 }
 0x3f4   :  { %10601 = vmatprep.mubr.msk.f32.mxu0 %vm11007_vm1, %v11006_v50  ;;  %10606 = vmatprep.mubr.msk.f32.mxu1 %vm11007_vm1, %v11006_v50  ;;  %v7332_v3 = vand.u32 4294901760, %v7331_v31 }
 0x3f5   :  { %10609 = vmatprep.subr.mxu0 %v11006_v50  ;;  %10614 = vmatprep.subr.mxu1 %v11006_v50  ;;  %v7823_v9 = vsub.f32 %v7821_v35, %v7822_v8 }
 0x3f6   :  { %10602 = vmatmul.mubr.f32.vlgmr.msra.gmra.mxu0 %v6881_v37  ;;  %10607 = vmatmul.mubr.f32.vlgmr.msra.gmra.mxu1 %v6881_v37  ;;  %v7333_v4 = vsub.f32 %v7331_v31, %v7332_v3 }
 0x3f7   :  { %10610 = vmatpush3.msra.mxu0 %v11833_v48  ;;  %10615 = vmatpush3.msra.mxu1 %v7375_v38  ;;  %v7824_v12 = vand.u32 4294901760, %v7823_v9 }
 0x3f8   :  { %v10838_v6 = vpop.eup %10837  ;;  %10611 = vmatprep.mubr.msk.f32.mxu0 %vm11007_vm1, %v11006_v50  ;;  %10616 = vmatprep.mubr.msk.f32.mxu1 %vm11007_vm1, %v11006_v50  ;;  %v7334_v7 = vand.u32 4294901760, %v7333_v4 }
 0x3f9   :  { %v5452_v26 = vmul.f32 %v10838_v6, %v11733_v59  ;;  %10619 = vmatprep.subr.mxu0 %v11006_v50  ;;  %10624 = vmatprep.subr.mxu1 %v11006_v50 }
 0x3fa   :  { %10612 = vmatmul.mubr.f32.vlgmr.msra.gmra.mxu0 %v7334_v7  ;;  %10617 = vmatmul.mubr.f32.vlgmr.msra.gmra.mxu1 %v7330_v45 }
 0x3fb   :  { %5462 = vst.msk [vmem:[#allocation12 + $0x28] sm:$0xff] %vm1768_vm2, %v5452_v26  ;;  %10620 = vmatpush3.msra.mxu0 %v11842_v53  ;;  %10625 = vmatpush3.msra.mxu1 %v11833_v48  ;;  %v7711_v11 = vsel %vm1768_vm2, %v5452_v26, 0 }
 0x3fc   :  { %10621 = vmatprep.mubr.msk.f32.mxu0 %vm11007_vm1, %v11006_v50  ;;  %10626 = vmatprep.mubr.msk.f32.mxu1 %vm11007_vm1, %v11006_v50  ;;  %v7779_v59 = vand.u32 4294901760, %v7711_v11 }
 0x3fd   :  { %10629 = vmatprep.subr.mxu0 %v11006_v50  ;;  %10634 = vmatprep.subr.mxu1 %v11006_v50 }
 0x3fe   :  { %10622 = vmatmul.mubr.f32.vlgmr.msra.gmra.mxu0 %v7331_v31  ;;  %10627 = vmatmul.mubr.f32.vlgmr.msra.gmra.mxu1 %v7332_v3  ;;  %v7780_v46 = vsub.f32 %v7711_v11, %v7779_v59 }
 0x3ff   :  { %10630 = vmatpush3.msra.mxu0 %v7373_v61  ;;  %10635 = vmatpush3.msra.mxu1 %v11833_v48 }
 0x400   :  { %10631 = vmatprep.mubr.msk.f32.mxu0 %vm11007_vm1, %v11006_v50  ;;  %10636 = vmatprep.mubr.msk.f32.mxu1 %vm11007_vm1, %v11006_v50  ;;  %v7781_v49 = vand.u32 4294901760, %v7780_v46 }
 0x401   :  { %10639 = vmatprep.subr.mxu0 %v11006_v50  ;;  %10644 = vmatprep.subr.mxu1 %v11006_v50 }
 0x402   :  { %10632 = vmatmul.mubr.f32.vlgmr.msra.gmra.mxu0 %v7330_v45  ;;  %10637 = vmatmul.mubr.f32.vlgmr.msra.gmra.mxu1 %v7330_v45  ;;  %v7782_v13 = vsub.f32 %v7780_v46, %v7781_v49 }
 0x403   :  { %10640 = vmatpush3.msra.mxu0 %v11856_v63  ;;  %10645 = vmatpush3.msra.mxu1 %v7824_v12 }
 0x404   :  { %10641 = vmatprep.mubr.msk.f32.mxu0 %vm11007_vm1, %v11006_v50  ;;  %10646 = vmatprep.mubr.msk.f32.mxu1 %vm11007_vm1, %v11006_v50  ;;  %v7783_v54 = vand.u32 4294901760, %v7782_v13 }
 0x405   :  { %10649 = vmatprep.subr.mxu0 %v11006_v50  ;;  %10654 = vmatprep.subr.mxu1 %v11006_v50 }
 0x406   :  { %10642 = vmatmul.mubr.f32.vlgmr.msra.gmra.mxu0 %v7783_v54  ;;  %10647 = vmatmul.mubr.f32.vlgmr.msra.gmra.mxu1 %v7779_v59 }
 0x407   :  { %10650 = vmatpush3.msra.mxu0 %v7821_v35  ;;  %10655 = vmatpush3.msra.mxu1 %v11856_v63 }
 0x408   :  { %10651 = vmatprep.mubr.msk.f32.mxu0 %vm11007_vm1, %v11006_v50  ;;  %10656 = vmatprep.mubr.msk.f32.mxu1 %vm11007_vm1, %v11006_v50 }
 0x409   :  { %10659 = vmatprep.subr.mxu0 %v11006_v50  ;;  %10664 = vmatprep.subr.mxu1 %v11006_v50 }
 0x40a   :  { %10652 = vmatmul.mubr.f32.vlgmr.msra.gmra.mxu0 %v7780_v46  ;;  %10657 = vmatmul.mubr.f32.vlgmr.msra.gmra.mxu1 %v7781_v49 }
 0x40b   :  { %10660 = vmatpush3.msra.mxu0 %v7822_v8  ;;  %10665 = vmatpush3.msra.mxu1 %v11856_v63 }
 0x40c   :  { %10661 = vmatprep.mubr.msk.f32.mxu0 %vm11007_vm1, %v11006_v50  ;;  %10666 = vmatprep.mubr.msk.f32.mxu1 %vm11007_vm1, %v11006_v50 }
 0x40d   :  { %10669 = vmatprep.subr.mxu0 %v11006_v50  ;;  %10674 = vmatprep.subr.mxu1 %v11006_v50 }
 0x40e   :  { %10662 = vmatmul.mubr.f32.vlgmr.msra.gmra.mxu0 %v7779_v59  ;;  %10667 = vmatmul.mubr.f32.vlgmr.msra.gmra.mxu1 %v7779_v59 }
 0x40f   :  { %10676 = vmatprep.mubr.msk.f32.mxu1 %vm11007_vm1, %v11006_v50  ;;  %10671 = vmatprep.mubr.msk.f32.mxu0 %vm11007_vm1, %v11006_v50 }
 0x413   :  { %v5437_v14 = vpop.xlane.xlu0 %5436 }
 0x414   :  { %10839 = vrcp.f32 %v5437_v14 }
 0x417   :  { %v1759_v15 = vpop.permute.xlu0 %1758 }
 0x418   :  { %v8193_v16 = vand.u32 4294901760, %v1759_v15 }
 0x41a   :  { %v11918_v17 = vsub.f32 %v1759_v15, %v8193_v16  ;;  %10670 = vmatpush3.msra.mxu0 %v8193_v16  ;;  %v5616_v1 = vpop.f32.mrf.mxu1 }
 0x41b   :  { %10679 = vmatprep.subr.mxu0 %v11006_v50 }
 0x41c   :  { %v8271_v18 = vand.u32 4294901760, %v11918_v17  ;;  %v10498_v55 = vpop.f32.mrf.mxu1 }
 0x41e   :  { %v8272_v21 = vsub.f32 %v11918_v17, %v8271_v18  ;;  %v5764_v22 = vpop.f32.mrf.mxu1 }
 0x41f   :  { %v5440_v23 = vpop.xlane.xlu1 %5439 }
 0x420   :  { %v8273_v24 = vand.u32 4294901760, %v8272_v21  ;;  %10841 = vrcp.f32 %v5440_v23  ;;  %v10508_v25 = vpop.f32.mrf.mxu1 }
 0x421   :  { %v10840_v27 = vpop.eup %10839 }
 0x422   :  { %10675 = vmatpush3.msra.mxu1 %v8273_v24  ;;  %v5910_v28 = vpop.f32.mrf.mxu1  ;;  %v5540_v30 = vpop.f32.mrf.mxu0  ;;  %v5454_v32 = vmul.f32 %v10840_v27, %v11770_v10 }
 0x423   :  { %v1765_v33 = vpop.permute.xlu1 %1764  ;;  %v5617_v19 = vadd.f32 %v5616_v1, %v5540_v30  ;;  %10684 = vmatprep.subr.mxu1 %v11006_v50 }
 0x424   :  { %v8642_v42 = vand.u32 4294901760, %v1765_v33  ;;  %v10493_v34 = vpop.f32.mrf.mxu0  ;;  %v10518_v36 = vpop.f32.mrf.mxu1  ;;  %5463 = vst.msk [vmem:[#allocation12 + $0x30] sm:$0xff] %vm1768_vm2, %v5454_v32  ;;  %v8160_v39 = vsel %vm1768_vm2, %v5454_v32, 0 }
 0x425   :  { %v8228_v2 = vand.u32 4294901760, %v8160_v39 }
 0x426   :  { %v8719_v40 = vsub.f32 %v1765_v33, %v8642_v42  ;;  %v5690_v37 = vpop.f32.mrf.mxu0 }
 0x427   :  { %v5691_v43 = vadd.f32 %v5690_v37, %v5617_v19  ;;  %v8229_v44 = vsub.f32 %v8160_v39, %v8228_v2  ;;  %10677 = vmatmul.mubr.f32.vlgmr.msra.gmra.mxu1 %v8228_v2 }
 0x428   :  { %v8720_v48 = vand.u32 4294901760, %v8719_v40  ;;  %10685 = vmatpush3.msra.mxu1 %v8193_v16  ;;  %v10503_v10 = vpop.f32.mrf.mxu0  ;;  %10686 = vmatprep.mubr.msk.f32.mxu1 %vm11007_vm1, %v11006_v50 }
 0x429   :  { %10694 = vmatprep.subr.mxu1 %v11006_v50  ;;  %v5765_v20 = vadd.f32 %v5764_v22, %v5691_v43  ;;  %v8230_v41 = vand.u32 4294901760, %v8229_v44 }
 0x42a   :  { %v8721_v51 = vsub.f32 %v8719_v40, %v8720_v48  ;;  %v5838_v52 = vpop.f32.mrf.mxu0 }
 0x42b   :  { %v5839_v53 = vadd.f32 %v5838_v52, %v5765_v20  ;;  %10687 = vmatmul.mubr.f32.vlgmr.msra.gmra.mxu1 %v8230_v41  ;;  %v8231_v56 = vsub.f32 %v8229_v44, %v8230_v41 }
 0x42c   :  { %v8722_v47 = vand.u32 4294901760, %v8721_v51  ;;  %10695 = vmatpush3.msra.mxu1 %v8193_v16  ;;  %v10513_v57 = vpop.f32.mrf.mxu0  ;;  %10696 = vmatprep.mubr.msk.f32.mxu1 %vm11007_vm1, %v11006_v50 }
 0x42d   :  { %v10842_v58 = vpop.eup %10841  ;;  %v11932_v29 = vadd.f32 %v5910_v28, %v5839_v53  ;;  %10704 = vmatprep.subr.mxu1 %v11006_v50  ;;  %v8232_v61 = vand.u32 4294901760, %v8231_v56 }
 0x42e   :  { %v5456_v62 = vmul.f32 %v10842_v58, %v11774_v5 }
 0x42f   :  { %10672 = vmatmul.mubr.f32.vlgmr.msra.gmra.mxu0 %v8232_v61  ;;  %10697 = vmatmul.mubr.f32.vlgmr.msra.gmra.mxu1 %v8228_v2 }
 0x430   :  { %10680 = vmatpush3.msra.mxu0 %v11918_v17  ;;  %10705 = vmatpush3.msra.mxu1 %v8722_v47  ;;  %5464 = vst.msk [vmem:[#allocation12 + $0x38] sm:$0xff] %vm1768_vm2, %v5456_v62  ;;  %v8609_v60 = vsel %vm1768_vm2, %v5456_v62, 0 }
 0x431   :  { %10681 = vmatprep.mubr.msk.f32.mxu0 %vm11007_vm1, %v11006_v50  ;;  %10689 = vmatprep.subr.mxu0 %v11006_v50  ;;  %v8677_v45 = vand.u32 4294901760, %v8609_v60 }
 0x432   :  { %10706 = vmatprep.mubr.msk.f32.mxu1 %vm11007_vm1, %v11006_v50  ;;  %10714 = vmatprep.subr.mxu1 %v11006_v50 }
 0x433   :  { %10682 = vmatmul.mubr.f32.vlgmr.msra.gmra.mxu0 %v8229_v44  ;;  %v8678_v5 = vsub.f32 %v8609_v60, %v8677_v45  ;;  %10707 = vmatmul.mubr.f32.vlgmr.msra.gmra.mxu1 %v8677_v45 }
 0x434   :  { %10690 = vmatpush3.msra.mxu0 %v8271_v18  ;;  %10715 = vmatpush3.msra.mxu1 %v8642_v42 }
 0x435   :  { %10691 = vmatprep.mubr.msk.f32.mxu0 %vm11007_vm1, %v11006_v50  ;;  %10699 = vmatprep.subr.mxu0 %v11006_v50  ;;  %v8679_v63 = vand.u32 4294901760, %v8678_v5 }
 0x436   :  { %10716 = vmatprep.mubr.msk.f32.mxu1 %vm11007_vm1, %v11006_v50  ;;  %10724 = vmatprep.subr.mxu1 %v11006_v50 }
 0x437   :  { %10692 = vmatmul.mubr.f32.vlgmr.msra.gmra.mxu0 %v8228_v2  ;;  %10717 = vmatmul.mubr.f32.vlgmr.msra.gmra.mxu1 %v8679_v63  ;;  %v8680_v0 = vsub.f32 %v8678_v5, %v8679_v63 }
 0x438   :  { %10700 = vmatpush3.msra.mxu0 %v8642_v42  ;;  %10725 = vmatpush3.msra.mxu1 %v8642_v42 }
 0x439   :  { %10701 = vmatprep.mubr.msk.f32.mxu0 %vm11007_vm1, %v11006_v50  ;;  %10709 = vmatprep.subr.mxu0 %v11006_v50  ;;  %v8681_v31 = vand.u32 4294901760, %v8680_v0 }
 0x43a   :  { %10726 = vmatprep.mubr.msk.f32.mxu1 %vm11007_vm1, %v11006_v50 }
 0x43b   :  { %10702 = vmatmul.mubr.f32.vlgmr.msra.gmra.mxu0 %v8681_v31  ;;  %10727 = vmatmul.mubr.f32.vlgmr.msra.gmra.mxu1 %v8677_v45 }
 0x43c   :  { %10710 = vmatpush3.msra.mxu0 %v8719_v40  ;;  %10711 = vmatprep.mubr.msk.f32.mxu0 %vm11007_vm1, %v11006_v50 }
 0x43d   :  { %10719 = vmatprep.subr.mxu0 %v11006_v50 }
 0x43f   :  { %10712 = vmatmul.mubr.f32.vlgmr.msra.gmra.mxu0 %v8678_v5 }
 0x440   :  { %10720 = vmatpush3.msra.mxu0 %v8720_v48  ;;  %10721 = vmatprep.mubr.msk.f32.mxu0 %vm11007_vm1, %v11006_v50 }
 0x443   :  { %10722 = vmatmul.mubr.f32.vlgmr.msra.gmra.mxu0 %v8677_v45 }
 0x48d   :  { %v6065_v3 = vpop.f32.mrf.mxu1 }
 0x48f   :  { %v10528_v35 = vpop.f32.mrf.mxu1 }
 0x491   :  { %v6213_v38 = vpop.f32.mrf.mxu1 }
 0x493   :  { %v10538_v4 = vpop.f32.mrf.mxu1 }
 0x495   :  { %v5989_v6 = vpop.f32.mrf.mxu0  ;;  %v6359_v7 = vpop.f32.mrf.mxu1 }
 0x496   :  { %v6066_v11 = vadd.f32 %v6065_v3, %v5989_v6 }
 0x497   :  { %v10523_v26 = vpop.f32.mrf.mxu0  ;;  %v10548_v8 = vpop.f32.mrf.mxu1 }
 0x499   :  { %v6139_v59 = vpop.f32.mrf.mxu0  ;;  %v6514_v9 = vpop.f32.mrf.mxu1 }
 0x49a   :  { %v6140_v46 = vadd.f32 %v6139_v59, %v6066_v11 }
 0x49b   :  { %v10533_v49 = vpop.f32.mrf.mxu0  ;;  %v10558_v12 = vpop.f32.mrf.mxu1 }
 0x49c   :  { %v6214_v13 = vadd.f32 %v6213_v38, %v6140_v46 }
 0x49d   :  { %v6287_v54 = vpop.f32.mrf.mxu0  ;;  %v6662_v14 = vpop.f32.mrf.mxu1 }
 0x49e   :  { %v6288_v15 = vadd.f32 %v6287_v54, %v6214_v13 }
 0x49f   :  { %v10543_v50 = vpop.f32.mrf.mxu0  ;;  %v10568_v16 = vpop.f32.mrf.mxu1 }
 0x4a0   :  { %v6360_v17 = vadd.f32 %v6359_v7, %v6288_v15 }
 0x4a1   :  { %v6438_v1 = vpop.f32.mrf.mxu0  ;;  %v6808_v18 = vpop.f32.mrf.mxu1 }
 0x4a2   :  { %9059 = vrot.lane.b32.xlu1 %v6360_v17, %s11002_s30  ;;  %v6515_v22 = vadd.f32 %v6514_v9, %v6438_v1 }
 0x4a3   :  { %v10553_v55 = vpop.f32.mrf.mxu0  ;;  %v10578_v21 = vpop.f32.mrf.mxu1 }
 0x4a5   :  { %v6588_v23 = vpop.f32.mrf.mxu0 }
 0x4a6   :  { %v6589_v24 = vadd.f32 %v6588_v23, %v6515_v22  ;;  %v9092_v22 = vld [vmem:[#allocation10 + $0x18] sm:$0xff] }
 0x4a7   :  { %v10563_v25 = vpop.f32.mrf.mxu0 }
 0x4a8   :  { %v6663_v27 = vadd.f32 %v6662_v14, %v6589_v24  ;;  %v11967_v24 = vand.u32 4294901760, %v9092_v22  ;;  %v9091_v25 = vld [vmem:[#allocation10 + $0x10] sm:$0xff] }
 0x4a9   :  { %v6736_v28 = vpop.f32.mrf.mxu0 }
 0x4aa   :  { %v6737_v30 = vadd.f32 %v6736_v28, %v6663_v27  ;;  %10729 = vmatprep.subr.mxu0 %v11967_v24 }
 0x4ab   :  { %v10573_v32 = vpop.f32.mrf.mxu0  ;;  %10730 = vmatpush3.msra.mxu0 %v11967_v24 }
 0x4ac   :  { %v6809_v33 = vadd.f32 %v6808_v18, %v6737_v30  ;;  %v11970_v30 = vsub.f32 %v9092_v22, %v11967_v24  ;;  %v11972_v32 = vand.u32 4294901760, %v9091_v25 }
 0x4ad   :  { %v6887_v19 = vpop.f32.mrf.mxu0 }
 0x4ae   :  { %v6963_v42 = vpop.f32.mrf.mxu1  ;;  %9067 = vrot.lane.b32.xlu0 %v6809_v33, %s11011_s26  ;;  %v9090_v33 = vld [vmem:[#allocation10 + $0x8] sm:$0xff]  ;;  %10731 = vmatprep.subr.mxu0 %v11972_v32 }
 0x4af   :  { %v10583_v34 = vpop.f32.mrf.mxu0  ;;  %v6964_v39 = vadd.f32 %v6963_v42, %v6887_v19  ;;  %v11975_v19 = vand.u32 4294901760, %v9090_v33  ;;  %10732 = vmatpush3.msra.mxu0 %v11972_v32 }
 0x4b0   :  { %v10588_v36 = vpop.f32.mrf.mxu1 }
 0x4b1   :  { %v11979_v36 = vand.u32 4294901760, %v11970_v30  ;;  %10733 = vmatprep.subr.mxu0 %v11975_v19 }
 0x4b2   :  { %v7037_v2 = vpop.f32.mrf.mxu0  ;;  %v7111_v40 = vpop.f32.mrf.mxu1  ;;  %10734 = vmatpush3.msra.mxu0 %v11975_v19 }
 0x4b3   :  { %v7038_v37 = vadd.f32 %v7037_v2, %v6964_v39  ;;  %v11982_v39 = vsub.f32 %v9091_v25, %v11972_v32 }
 0x4b4   :  { %v10593_v43 = vpop.f32.mrf.mxu0  ;;  %v10598_v44 = vpop.f32.mrf.mxu1 }
 0x4b5   :  { %v7112_v48 = vadd.f32 %v7111_v40, %v7038_v37  ;;  %v11986_v40 = vsub.f32 %v9090_v33, %v11975_v19  ;;  %v9089_v37 = vld [vmem:[#allocation10] sm:$0xff] }
 0x4b6   :  { %v7185_v10 = vpop.f32.mrf.mxu0  ;;  %v7257_v20 = vpop.f32.mrf.mxu1 }
 0x4b7   :  { %v7186_v41 = vadd.f32 %v7185_v10, %v7112_v48  ;;  %v9216_v48 = vsub.f32 %v11970_v30, %v11979_v36  ;;  %v11992_v10 = vand.u32 4294901760, %v11982_v39 }
 0x4b8   :  { %v10603_v51 = vpop.f32.mrf.mxu0  ;;  %v10608_v52 = vpop.f32.mrf.mxu1 }
 0x4b9   :  { %v7258_v53 = vadd.f32 %v7257_v20, %v7186_v41  ;;  %v11994_v20 = vand.u32 4294901760, %v9089_v37  ;;  %v11998_v51 = vand.u32 4294901760, %v11986_v40 }
 0x4ba   :  { %v7336_v56 = vpop.f32.mrf.mxu0  ;;  %v7412_v47 = vpop.f32.mrf.mxu1 }
 0x4bb   :  { %v7413_v57 = vadd.f32 %v7412_v47, %v7336_v56  ;;  %9075 = vrot.lane.b32.xlu0 %v7258_v53, %s11012_s27  ;;  %v9217_v56 = vand.u32 4294901760, %v9216_v48  ;;  %v9223_v47 = vsub.f32 %v11982_v39, %v11992_v10  ;;  %10735 = vmatprep.subr.mxu0 %v11994_v20 }
 0x4bc   :  { %v10613_v58 = vpop.f32.mrf.mxu0  ;;  %v10618_v61 = vpop.f32.mrf.mxu1  ;;  %10736 = vmatpush3.msra.mxu0 %v11994_v20 }
 0x4bd   :  { %v9230_v61 = vsub.f32 %v11986_v40, %v11998_v51  ;;  %10740 = vmatprep.subr.mxu1 %v9217_v56  ;;  %10751 = vmatprep.subr.mxu0 %v11970_v30 }
 0x4be   :  { %v7486_v62 = vpop.f32.mrf.mxu0  ;;  %v7560_v60 = vpop.f32.mrf.mxu1  ;;  %10741 = vmatpush3.msra.mxu1 %v9217_v56 }
 0x4bf   :  { %v7487_v45 = vadd.f32 %v7486_v62, %v7413_v57  ;;  %v12004_v57 = vsub.f32 %v9089_v37, %v11994_v20 }
 0x4c0   :  { %v10623_v5 = vpop.f32.mrf.mxu0  ;;  %v10628_v63 = vpop.f32.mrf.mxu1 }
 0x4c1   :  { %v7561_v0 = vadd.f32 %v7560_v60, %v7487_v45  ;;  %v9224_v45 = vand.u32 4294901760, %v9223_v47  ;;  %v12011_v5 = vand.u32 4294901760, %v12004_v57 }
 0x4c2   :  { %v7634_v31 = vpop.f32.mrf.mxu0  ;;  %v7706_v3 = vpop.f32.mrf.mxu1 }
 0x4c3   :  { %v7635_v35 = vadd.f32 %v7634_v31, %v7561_v0  ;;  %v9231_v0 = vand.u32 4294901760, %v9230_v61  ;;  %10742 = vmatprep.subr.mxu1 %v9224_v45 }
 0x4c4   :  { %v10633_v38 = vpop.f32.mrf.mxu0  ;;  %v10638_v4 = vpop.f32.mrf.mxu1  ;;  %10743 = vmatpush3.msra.mxu1 %v9224_v45 }
 0x4c5   :  { %v11964_v6 = vadd.f32 %v7706_v3, %v7635_v35  ;;  %v9237_v35 = vsub.f32 %v12004_v57, %v12011_v5  ;;  %10744 = vmatprep.subr.mxu1 %v9231_v0 }
 0x4c6   :  { %v7785_v7 = vpop.f32.mrf.mxu0  ;;  %v7861_v26 = vpop.f32.mrf.mxu1  ;;  %10745 = vmatpush3.msra.mxu1 %v9231_v0 }
 0x4c7   :  { %v7862_v59 = vadd.f32 %v7861_v26, %v7785_v7  ;;  %v9238_v26 = vand.u32 4294901760, %v9237_v35 }
 0x4c8   :  { %v10643_v8 = vpop.f32.mrf.mxu0  ;;  %v10648_v11 = vpop.f32.mrf.mxu1 }
 0x4c9   :  { %10746 = vmatprep.subr.mxu1 %v9238_v26 }
 0x4ca   :  { %v7935_v9 = vpop.f32.mrf.mxu0  ;;  %v8009_v46 = vpop.f32.mrf.mxu1  ;;  %10747 = vmatpush3.msra.mxu1 %v9238_v26 }
 0x4cb   :  { %v7936_v49 = vadd.f32 %v7935_v9, %v7862_v59  ;;  %10762 = vmatprep.subr.mxu1 %v11967_v24 }
 0x4cc   :  { %v10653_v12 = vpop.f32.mrf.mxu0  ;;  %v10658_v13 = vpop.f32.mrf.mxu1 }
 0x4cd   :  { %v8010_v54 = vadd.f32 %v8009_v46, %v7936_v49 }
 0x4ce   :  { %v8083_v14 = vpop.f32.mrf.mxu0  ;;  %v8155_v15 = vpop.f32.mrf.mxu1 }
 0x4cf   :  { %v8084_v50 = vadd.f32 %v8083_v14, %v8010_v54 }
 0x4d0   :  { %v10663_v16 = vpop.f32.mrf.mxu0  ;;  %v10668_v17 = vpop.f32.mrf.mxu1 }
 0x4d1   :  { %v8156_v1 = vadd.f32 %v8155_v15, %v8084_v50 }
 0x4d3   :  { %9061 = vrot.lane.b32.xlu1 %v8156_v1, %s11002_s30 }
 0x4e7   :  { %v8310_v18 = vpop.f32.mrf.mxu1 }
 0x4e9   :  { %v10678_v55 = vpop.f32.mrf.mxu1 }
 0x4eb   :  { %v8458_v21 = vpop.f32.mrf.mxu1 }
 0x4ed   :  { %v10688_v23 = vpop.f32.mrf.mxu1 }
 0x4ef   :  { %v8234_v27 = vpop.f32.mrf.mxu0  ;;  %v8604_v28 = vpop.f32.mrf.mxu1 }
 0x4f0   :  { %v8311_v2 = vadd.f32 %v8310_v18, %v8234_v27 }
 0x4f1   :  { %v10673_v42 = vpop.f32.mrf.mxu0  ;;  %v10698_v34 = vpop.f32.mrf.mxu1 }
 0x4f3   :  { %v8384_v43 = vpop.f32.mrf.mxu0  ;;  %v8759_v44 = vpop.f32.mrf.mxu1 }
 0x4f4   :  { %v8385_v41 = vadd.f32 %v8384_v43, %v8311_v2 }
 0x4f5   :  { %v10683_v52 = vpop.f32.mrf.mxu0  ;;  %v10708_v53 = vpop.f32.mrf.mxu1 }
 0x4f6   :  { %v8459_v58 = vadd.f32 %v8458_v21, %v8385_v41 }
 0x4f7   :  { %v8532_v62 = vpop.f32.mrf.mxu0  ;;  %v8907_v60 = vpop.f32.mrf.mxu1 }
 0x4f8   :  { %v8533_v63 = vadd.f32 %v8532_v62, %v8459_v58 }
 0x4f9   :  { %v10693_v31 = vpop.f32.mrf.mxu0  ;;  %v10718_v3 = vpop.f32.mrf.mxu1 }
 0x4fa   :  { %v8605_v38 = vadd.f32 %v8604_v28, %v8533_v63  ;;  %v10847_v31 = vld [vmem:[#allocation2 + $0x8] sm:$0xff] }
 0x4fb   :  { %v8683_v4 = vpop.f32.mrf.mxu0  ;;  %v9053_v7 = vpop.f32.mrf.mxu1 }
 0x4fc   :  { %9069 = vrot.lane.b32.xlu1 %v8605_v38, %s11011_s26  ;;  %v8760_v59 = vadd.f32 %v8759_v44, %v8683_v4  ;;  %v10848_v38 = vld [vmem:[#allocation2] sm:$0xff] }
 0x4fd   :  { %v10703_v8 = vpop.f32.mrf.mxu0  ;;  %v10728_v11 = vpop.f32.mrf.mxu1 }
 0x4ff   :  { %v8833_v9 = vpop.f32.mrf.mxu0 }
 0x500   :  { %v8834_v46 = vadd.f32 %v8833_v9, %v8760_v59 }
 0x501   :  { %v10713_v49 = vpop.f32.mrf.mxu0 }
 0x502   :  { %v8908_v12 = vadd.f32 %v8907_v60, %v8834_v46 }
 0x503   :  { %v8981_v13 = vpop.f32.mrf.mxu0 }
 0x504   :  { %v8982_v54 = vadd.f32 %v8981_v13, %v8908_v12 }
 0x505   :  { %v10723_v14 = vpop.f32.mrf.mxu0 }
 0x506   :  { %v9054_v15 = vadd.f32 %v9053_v7, %v8982_v54 }
 0x508   :  { %9077 = vrot.lane.b32.xlu1 %v9054_v15, %s11012_s27 }
 0x514   :  { %v9060_v50 = vpop.permute.xlu1 %9059 }
 0x515   :  { %v9081_v17 = vsel %vm1768_vm2, %v11932_v29, %v9060_v50 }
 0x520   :  { %v9068_v16 = vpop.permute.xlu0 %9067 }
 0x521   :  { %v9084_v1 = vsel %vm9083_vm3, %v9081_v17, %v9068_v16 }
 0x52d   :  { %v9076_v18 = vpop.permute.xlu0 %9075 }
 0x52e   :  { %v9087_v55 = vsel %vm9086_vm4, %v9084_v1, %v9076_v18 }
 0x52f   :  { %v9094_v21 = vsel %vm105_vm0, %v9087_v55, 0 }
 0x530   :  { %v9168_v22 = vand.u32 4294901760, %v9094_v21 }
 0x532   :  { %v9169_v23 = vsub.f32 %v9094_v21, %v9168_v22  ;;  %10748 = vmatprep.mubr.f32.mxu1 %v9168_v22 }
 0x534   :  { %v9170_v25 = vand.u32 4294901760, %v9169_v23 }
 0x536   :  { %v9171_v27 = vsub.f32 %v9169_v23, %v9170_v25 }
 0x538   :  { %v9172_v28 = vand.u32 4294901760, %v9171_v27 }
 0x53a   :  { %10737 = vmatprep.mubr.f32.mxu0 %v9172_v28 }
 0x545   :  { %v9062_v33 = vpop.permute.xlu1 %9061 }
 0x546   :  { %v9082_v34 = vsel %vm1768_vm2, %v11964_v6, %v9062_v33 }
 0x56e   :  { %v9070_v42 = vpop.permute.xlu1 %9069 }
 0x56f   :  { %v9085_v29 = vsel %vm9083_vm3, %v9082_v34, %v9070_v42 }
 0x57a   :  { %v9078_v2 = vpop.permute.xlu1 %9077 }
 0x57b   :  { %v9088_v37 = vsel %vm9086_vm4, %v9085_v29, %v9078_v2 }
 0x57c   :  { %v9097_v43 = vsel %vm105_vm0, %v9088_v37, 0 }
 0x57d   :  { %v9178_v44 = vand.u32 4294901760, %v9097_v43 }
 0x57f   :  { %v9179_v48 = vsub.f32 %v9097_v43, %v9178_v44  ;;  %10749 = vmatmul.mubr.f32.vlgmr.msra.gmra.mxu1 %v9178_v44 }
 0x580   :  { %10763 = vmatpush3.msra.mxu1 %v11967_v24  ;;  %10770 = vmatprep.mubr.f32.mxu1 %v9170_v25 }
 0x581   :  { %v9180_v41 = vand.u32 4294901760, %v9179_v48  ;;  %10764 = vmatprep.subr.mxu1 %v11972_v32 }
 0x582   :  { %10765 = vmatpush3.msra.mxu1 %v11972_v32 }
 0x583   :  { %v9181_v52 = vsub.f32 %v9179_v48, %v9180_v41  ;;  %10766 = vmatprep.subr.mxu1 %v11975_v19 }
 0x584   :  { %10767 = vmatpush3.msra.mxu1 %v11975_v19 }
 0x585   :  { %v9182_v6 = vand.u32 4294901760, %v9181_v52  ;;  %10768 = vmatprep.subr.mxu1 %v11994_v20 }
 0x586   :  { %10769 = vmatpush3.msra.mxu1 %v11994_v20 }
 0x587   :  { %10771 = vmatmul.mubr.f32.vlgmr.msra.gmra.mxu1 %v9180_v41  ;;  %10784 = vmatprep.subr.mxu1 %v11967_v24 }
 0x588   :  { %10738 = vmatmul.mubr.f32.vlgmr.msra.gmra.mxu0 %v9182_v6  ;;  %10785 = vmatpush3.msra.mxu1 %v11967_v24 }
 0x589   :  { %10752 = vmatpush3.msra.mxu0 %v11970_v30  ;;  %10792 = vmatprep.mubr.f32.mxu1 %v9168_v22 }
 0x58a   :  { %10753 = vmatprep.subr.mxu0 %v11982_v39  ;;  %10759 = vmatprep.mubr.f32.mxu0 %v9169_v23 }
 0x58b   :  { %10786 = vmatprep.subr.mxu1 %v11972_v32  ;;  %10754 = vmatpush3.msra.mxu0 %v11982_v39 }
 0x58c   :  { %10787 = vmatpush3.msra.mxu1 %v11972_v32  ;;  %10755 = vmatprep.subr.mxu0 %v11986_v40 }
 0x58d   :  { %10788 = vmatprep.subr.mxu1 %v11975_v19  ;;  %10756 = vmatpush3.msra.mxu0 %v11986_v40 }
 0x58e   :  { %10789 = vmatpush3.msra.mxu1 %v11975_v19  ;;  %10757 = vmatprep.subr.mxu0 %v12004_v57 }
 0x58f   :  { %10790 = vmatprep.subr.mxu1 %v11994_v20  ;;  %10758 = vmatpush3.msra.mxu0 %v12004_v57 }
 0x590   :  { %10791 = vmatpush3.msra.mxu1 %v11994_v20  ;;  %10760 = vmatmul.mubr.f32.vlgmr.msra.gmra.mxu0 %v9179_v48 }
 0x591   :  { %10773 = vmatprep.subr.mxu0 %v11979_v36  ;;  %10793 = vmatmul.mubr.f32.vlgmr.msra.gmra.mxu1 %v9178_v44 }
 0x592   :  { %10774 = vmatpush3.msra.mxu0 %v11979_v36  ;;  %10781 = vmatprep.mubr.f32.mxu0 %v9168_v22 }
 0x593   :  { %10775 = vmatprep.subr.mxu0 %v11992_v10 }
 0x594   :  { %10776 = vmatpush3.msra.mxu0 %v11992_v10 }
 0x595   :  { %10777 = vmatprep.subr.mxu0 %v11998_v51 }
 0x596   :  { %10778 = vmatpush3.msra.mxu0 %v11998_v51 }
 0x597   :  { %10779 = vmatprep.subr.mxu0 %v12011_v5 }
 0x598   :  { %10780 = vmatpush3.msra.mxu0 %v12011_v5 }
 0x599   :  { %10782 = vmatmul.mubr.f32.vlgmr.msra.gmra.mxu0 %v9178_v44 }
 0x63f   :  { %v10750_v30 = vpop.f32.mrf.mxu1 }
 0x641   :  { %v9275_v39 = vpop.f32.mrf.mxu1 }
 0x647   :  { %v10772_v40 = vpop.f32.mrf.mxu1 }
 0x648   :  { %v10739_v24 = vpop.f32.mrf.mxu0 }
 0x649   :  { %v9282_v36 = vadd.f32 %v10750_v30, %v10739_v24  ;;  %v9445_v47 = vpop.f32.mrf.mxu1 }
 0x64a   :  { %v9174_v32 = vpop.f32.mrf.mxu0 }
 0x64b   :  { %v9276_v53 = vadd.f32 %v9275_v39, %v9174_v32 }
 0x650   :  { %v10761_v19 = vpop.f32.mrf.mxu0 }
 0x651   :  { %v9369_v56 = vadd.f32 %v10761_v19, %v9282_v36  ;;  %v10794_v58 = vpop.f32.mrf.mxu1 }
 0x652   :  { %v9361_v20 = vpop.f32.mrf.mxu0 }
 0x653   :  { %v9362_v10 = vadd.f32 %v9361_v20, %v9276_v53  ;;  %v9454_v57 = vadd.f32 %v10772_v40, %v9369_v56  ;;  %v9617_v63 = vpop.f32.mrf.mxu1 }
 0x655   :  { %v9446_v62 = vadd.f32 %v9445_v47, %v9362_v10 }
 0x659   :  { %v10783_v51 = vpop.f32.mrf.mxu0 }
 0x65a   :  { %v9543_v61 = vadd.f32 %v10783_v51, %v9454_v57 }
 0x65b   :  { %v9536_v60 = vpop.f32.mrf.mxu0 }
 0x65c   :  { %v9624_v45 = vadd.f32 %v10794_v58, %v9543_v61  ;;  %v9537_v5 = vadd.f32 %v9536_v60, %v9446_v62 }
 0x65e   :  { %v9618_v0 = vadd.f32 %v9617_v63, %v9537_v5  ;;  %v9628_v3 = vadd.f32 %v10847_v31, %v9624_v45 }
 0x660   :  { %v9632_v35 = vsel %vm105_vm0, %v9628_v3, 0.0  ;;  %v9627_v4 = vadd.f32 %v10848_v38, %v9618_v0 }
 0x661   :  { %9633 = vadd.xlane.f32.xlu1 %v9632_v35 }
 0x662   :  { %v9629_v7 = vsel %vm105_vm0, %v9627_v4, 0.0 }
 0x663   :  { %9630 = vadd.xlane.f32.xlu0 %v9629_v7 }
 0x6ea   :  { %v9634_v26 = vpop.xlane.xlu1 %9633 }
 0x6eb   :  { %v9637_v8 = vmul.f32 0.03125, %v9634_v26 }
 0x6ec   :  { %v9631_v11 = vpop.xlane.xlu0 %9630 }
 0x6ed   :  { %v9636_v59 = vmul.f32 0.03125, %v9631_v11  ;;  %v9639_v9 = vsub.f32 %v9628_v3, %v9637_v8 }
 0x6ef   :  { %v9638_v46 = vsub.f32 %v9627_v4, %v9636_v59  ;;  %v9641_v13 = vmul.f32 %v9639_v9, %v9639_v9 }
 0x6f1   :  { %v9640_v49 = vmul.f32 %v9638_v46, %v9638_v46  ;;  %v9645_v54 = vsel %vm105_vm0, %v9641_v13, 0.0 }
 0x6f3   :  { %v9642_v12 = vsel %vm105_vm0, %v9640_v49, 0.0 }
 0x6f4   :  { %9643 = vadd.xlane.f32.xlu0 %v9642_v12 }
 0x6f8   :  { %9646 = vadd.xlane.f32.xlu0 %v9645_v54 }
 0x6f9   :  { %10960 = shalt.err (!%p10957_p1)
}
 0x6fa   :  { %9700 = dma.vmem_to_hbm [thread:$0]  %s9695_s8, 1024, %s12090_s7, [#allocation13], %s11001_s29, %s11001_s29, %s11002_s30  }
 0x6fb   :  { %v9712_v55 = vld [vmem:[%s12088_s5] ss:$0 sm:$0xff]  ;;  %v9714_v22 = vld [vmem:[%s12088_s5 + $0x1] ss:$0 sm:$0xff]  ;;  %s11014_s7 = smov [#allocation11]  }
 0x6fc   :  { %s9682_s16 = sshll.u32 %s11014_s7, 4  ;;  %s9683_s16 = int_to_ptr.vmem [resolvable:$true] %s9682_s16 }
 0x6fd   :  { %s10969_s1 = scalar_lea.vmem %s9683_s16, 256  ;;  %p10974_p3 = scmp.lt.s32.totalorder %s9683_s16, %s9683_s16 }
 0x6fe   :  { %p10970_p2 = scmp.ne.s32.totalorder %s9683_s16, %s10969_s1  ;;  %p10975_p4 = scmp.lt.s32.totalorder %s10969_s1, %s10969_s1 }
 0x700   :  { %p10976_p5 = por %p10975_p4, %p10974_p3 }
 0x702   :  { %p10977_p6 = pnand %p10976_p5, %p10970_p2 }
 0x77d   :  { %v9644_v14 = vpop.xlane.xlu0 %9643 }
 0x77e   :  { %v9648_v15 = vmul.f32 0.03125, %v9644_v14 }
 0x780   :  { %v9650_v50 = vadd.f32 1e-06, %v9648_v15 }
 0x781   :  { %v9647_v16 = vpop.xlane.xlu0 %9646 }
 0x782   :  { %10843 = vrsqrt.f32 %v9650_v50  ;;  %v9649_v17 = vmul.f32 0.03125, %v9647_v16 }
 0x784   :  { %v9651_v1 = vadd.f32 1e-06, %v9649_v17 }
 0x786   :  { %10845 = vrsqrt.f32 %v9651_v1 }
 0x78f   :  { %v10844_v18 = vpop.eup %10843 }
 0x790   :  { %v9654_v21 = vmul.f32 %v10844_v18, %v9638_v46 }
 0x792   :  { %v9663_v23 = vmul.f32 %v9712_v55, %v9654_v21 }
 0x793   :  { %v10846_v25 = vpop.eup %10845 }
 0x794   :  { %v9655_v27 = vmul.f32 %v10846_v25, %v9639_v9  ;;  %v9673_v28 = vadd.f32 %v9714_v22, %v9663_v23 }
 0x796   :  { %v9664_v33 = vmul.f32 %v9712_v55, %v9655_v27  ;;  %9675 = vst.msk [vmem:[#allocation11] sm:$0xff] %vm105_vm0, %v9673_v28 }
 0x798   :  { %v9674_v42 = vadd.f32 %v9714_v22, %v9664_v33 }
 0x79a   :  { %9676 = vst.msk [vmem:[#allocation11 + $0x8] sm:$0xff] %vm105_vm0, %v9674_v42 }
 0x79b   :  { %10980 = shalt.err (!%p10977_p6)
}
 0x79c   :  { %9688 = dma.vmem_to_hbm [thread:$0]  %s9683_s16, 256, %s12089_s6, [#allocation4], %s11001_s29, %s11001_s29, %s11002_s30  }
 0x79d   :  { %10995 = dma.done.wait [#allocation4], 256  }
 0x79e   :  { %10996 = vsyncadd [#allocation4], 4294967040 }
 0x79f   :  { %10997 = dma.done.wait [#allocation13], 1024  }
 0x7a0   :  { %10998 = vsyncadd [#allocation13], 4294966272 }
 0x7a1   :  { %9707 = vsyncpa [#allocation3], 1 }
 0x7a2   :  { %9708 = vsyncpa [#allocation6], 1 }
 0x7a3   :  { %9709 = vsyncpa [#allocation9], 1 }
 0x7a4   :  { %9710 = vsyncpa [#allocation4], 1 }
 0x7a5   :  { %9711 = vsyncpa [#allocation13], 1 }

</bundles_post_ra>
